<compile_context>
chip_gen: v5e
topology: v5e:2x2
jax: 0.10.0
libtpu: 0.0.40
codegen_flags: <defaults>
</compile_context>

<pallas_src>
import numpy as np
import jax
import jax.numpy as jnp
from jax.experimental import pallas as pl
from jax.experimental.pallas import tpu as pltpu

_EPS = 1e-5  # torch.nn.InstanceNorm2d default eps (affine=False by default)


# --------------------------------------------------------------------------
# Fused kernel (single block, no grid)
#   xaug : (10*Cin+1, N*HW) bf16  = [im2col(x); x_flat; ones] folded over N
#   wbd  : (2*Cout, 10*Cin+1) bf16 block-diag [W3_flip | 0 | b3 ; 0 | W1 | b1]
#   mt   : (HW, Hout*Wout) bf16   bicubic operator kron(kh, kw)^T
#   out  : (N*Cout, Hout*Wout) f32, rows ordered batch-major (n*Cout + c)
# --------------------------------------------------------------------------
def _make_kernel(n, cout, hw, houtwout):
    def kernel(xaug_ref, wbd_ref, mt_ref, out_ref):
        # Matmul 1: ConvT3x3 (as conv w/ flipped kernel) + ConvT1x1 skip +
        # both biases, all in one MXU matmul over every batch at once.
        res = jnp.dot(wbd_ref[...], xaug_ref[...],
                      preferred_element_type=jnp.float32)     # (2*Cout, N*HW)
        conv3 = res[:cout].reshape(cout, n, hw)               # (Cout, N, HW)
        skip = res[cout:].reshape(cout, n, hw)

        # InstanceNorm2d (affine=False, biased var) + ReLU, per (n, c) row.
        # Two-pass (centered) variance; rsqrt goes to the EUP slot.
        mean1 = jnp.mean(conv3, axis=2, keepdims=True)
        cent1 = conv3 - mean1
        var1 = jnp.mean(cent1 * cent1, axis=2, keepdims=True)
        x1 = jnp.maximum(cent1 * jax.lax.rsqrt(var1 + _EPS), 0.0) + skip

        # (Cout, N, HW) -> (N*Cout, HW): batch-major rows so the final
        # (N, Cout, 2H, 2W) view is a free contiguous reshape host-side.
        x1b = jnp.transpose(x1, (1, 0, 2)).reshape(n * cout, hw)

        # Matmul 2: bicubic 2x upsample (align_corners=True) as ONE lane-dense
        # bf16 matmul, then InstanceNorm + ReLU.
        up = jnp.dot(x1b.astype(mt_ref.dtype), mt_ref[...],
                     preferred_element_type=jnp.float32)      # (N*Cout, 4*HW)
        mean2 = jnp.mean(up, axis=1, keepdims=True)
        cent2 = up - mean2
        var2 = jnp.mean(cent2 * cent2, axis=1, keepdims=True)
        out_ref[...] = jnp.maximum(cent2 * jax.lax.rsqrt(var2 + _EPS), 0.0)

    return kernel


def _fused_upsample_call(xaug, wbd, mt, n, cout):
    kdim, nhw = xaug.shape
    hw = nhw // n
    houtwout = mt.shape[1]
    kernel = _make_kernel(n, cout, hw, houtwout)
    return pl.pallas_call(
        kernel,
        out_shape=jax.ShapeDtypeStruct((n * cout, houtwout), jnp.float32),
        # Single block, everything VMEM-resident; no grid => no pipeline
        # overhead and no double-buffering of the constant operands.
        in_specs=[pl.BlockSpec(memory_space=pltpu.MemorySpace.VMEM)] * 3,
        out_specs=pl.BlockSpec(memory_space=pltpu.MemorySpace.VMEM),
    )(xaug, wbd, mt)


# --------------------------------------------------------------------------
# One-time (init-time) operator assembly — NOT inside the jitted forward.
# --------------------------------------------------------------------------
def _bicubic_matrix(l_in, l_out, a=-0.75):
    """Dense 1D bicubic interpolation matrix, PyTorch align_corners=True."""
    def cc1(x):  # |x| <= 1
        return ((a + 2.0) * x - (a + 3.0)) * x * x + 1.0

    def cc2(x):  # 1 < |x| < 2
        return ((a * x - 5.0 * a) * x + 8.0 * a) * x - 4.0 * a

    m = np.zeros((l_out, l_in), dtype=np.float32)
    scale = (l_in - 1) / (l_out - 1) if l_out > 1 else 0.0
    for i in range(l_out):
        s = scale * i
        i0 = int(np.floor(s))
        t = s - i0
        coeffs = [cc2(t + 1.0), cc1(t), cc1(1.0 - t), cc2(2.0 - t)]
        for k in range(4):
            idx = min(max(i0 - 1 + k, 0), l_in - 1)
            m[i, idx] += coeffs[k]
    return m


def prepare_operators(w3, b3, w1, b1, h, w):
    """Build the fused block-diagonal weight and bicubic operator once."""
    cin, cout = w3.shape[0], w3.shape[1]
    # ConvTranspose2d(k=3, s=1, p=1) == Conv2d with flipped kernel, pad=1.
    w_flip = w3[:, :, ::-1, ::-1]
    w3m = jnp.transpose(w_flip, (1, 0, 2, 3)).reshape(cout, cin * 9)
    w1m = w1[:, :, 0, 0].T                                   # (Cout, Cin)
    # Block-diagonal weight + bias column (matched by the ones row in xaug).
    kdim = 10 * cin + 1
    wbd = jnp.zeros((2 * cout, kdim), jnp.float32)
    wbd = wbd.at[:cout, :9 * cin].set(w3m)
    wbd = wbd.at[cout:, 9 * cin:10 * cin].set(w1m)
    wbd = wbd.at[:cout, 10 * cin].set(b3)
    wbd = wbd.at[cout:, 10 * cin].set(b1)
    # Combined separable-bicubic operator: up_flat = x1_flat @ kron(kh, kw)^T.
    kh = _bicubic_matrix(h, 2 * h)                           # (2H, H)
    kw = _bicubic_matrix(w, 2 * w)                           # (2W, W)
    mt = np.kron(kh, kw).T.astype(np.float32)                # (HW, 4*HW)
    # bf16 operands: halve mt DMA, bf16 MXU path (validated tolerance caveat).
    return wbd.astype(jnp.bfloat16), jnp.asarray(mt, jnp.bfloat16)


def init_params(key, in_channel, out_channel):
    k1, k2, k3, k4 = jax.random.split(key, 4)
    # Same layout as torch: ConvTranspose2d weight is (Cin, Cout, kH, kW)
    w3 = jax.random.normal(k1, (in_channel, out_channel, 3, 3), jnp.float32) * 0.1
    b3 = jax.random.normal(k2, (out_channel,), jnp.float32) * 0.1
    w1 = jax.random.normal(k3, (in_channel, out_channel, 1, 1), jnp.float32) * 0.1
    b1 = jax.random.normal(k4, (out_channel,), jnp.float32) * 0.1
    return w3, b3, w1, b1


# --------------------------------------------------------------------------
# Jitted forward: only the x-dependent im2col + the fused pallas_call.
# --------------------------------------------------------------------------
@jax.jit
def upsample_forward(x, wbd, mt):
    """Forward pass of UpSample.  x: (N, Cin, H, W) float32 (NCHW)."""
    n, cin, h, w = x.shape
    cout = wbd.shape[0] // 2
    hw = h * w
    hout, wout = 2 * h, 2 * w

    # Tiny host-side im2col for the 3x3 conv (80 KB at these shapes); move
    # in-kernel (pltpu.roll + edge masks) once Cin*H*W grows.
    x_pad = jnp.pad(x, ((0, 0), (0, 0), (1, 1), (1, 1)))
    patches = jnp.stack(
        [x_pad[:, :, kh:kh + h, kw:kw + w] for kh in range(3) for kw in range(3)],
        axis=2)                                              # (N, Cin, 9, H, W)
    xcol = patches.reshape(n, cin * 9, hw)                   # (N, 9*Cin, HW)
    xflat = x.reshape(n, cin, hw)                            # (N, Cin,   HW)
    ones = jnp.ones((n, 1, hw), x.dtype)                     # bias row
    xaug = jnp.concatenate([xcol, xflat, ones], axis=1)      # (N, K, HW)
    # Fold batch into the lane (column) dimension: (K, N*HW), bf16 for MXU.
    xaug = jnp.transpose(xaug, (1, 0, 2)).reshape(10 * cin + 1, n * hw)
    xaug = xaug.astype(jnp.bfloat16)

    out_flat = _fused_upsample_call(xaug, wbd, mt, n, cout)  # (N*Cout, 4*HW)
    return out_flat.reshape(n, cout, hout, wout)             # free contiguous view


if __name__ == "__main__":
    key = jax.random.PRNGKey(0)
    kx, kp = jax.random.split(key)

    N, Cin, Cout, H, W = 2, 4, 8, 16, 16
    x = jax.random.normal(kx, (N, Cin, H, W), jnp.float32)
    w3, b3, w1, b1 = init_params(kp, Cin, Cout)
    wbd, mt = prepare_operators(w3, b3, w1, b1, H, W)        # once, at init

    out = upsample_forward(x, wbd, mt)
    jax.block_until_ready(out)

    assert out.shape == (N, Cout, 2 * H, 2 * W), out.shape
    assert out.dtype == jnp.float32
    assert bool(jnp.all(jnp.isfinite(out)))
    assert bool(jnp.all(out >= 0.0))  # final ReLU

    print("KERNEL_OK")
</pallas_src>

<mosaic_0001>
module attributes {stable_mosaic.version = 11 : i64} {
  func.func @kernel(%arg0: memref<41x512xbf16, #tpu.memory_space<vmem>>, %arg1: memref<16x41xbf16, #tpu.memory_space<vmem>>, %arg2: memref<256x1024xbf16, #tpu.memory_space<vmem>>, %arg3: memref<16x1024xf32, #tpu.memory_space<vmem>>) attributes {dimension_semantics = [], scalar_prefetch = 0 : i64, scratch_operands = 0 : i64, tpu.core_type = #tpu.core_type<tc>} {
    %c0 = arith.constant 0 : index
    %c0_0 = arith.constant 0 : index
    %0 = vector.load %arg1[%c0, %c0_0] : memref<16x41xbf16, #tpu.memory_space<vmem>>, vector<16x41xbf16>
    %c0_1 = arith.constant 0 : index
    %c0_2 = arith.constant 0 : index
    %1 = vector.load %arg0[%c0_1, %c0_2] : memref<41x512xbf16, #tpu.memory_space<vmem>>, vector<41x512xbf16>
    %cst = arith.constant dense<0.000000e+00> : vector<16x512xf32>
    %2 = tpu.matmul %0, %1, %cst {dimension_numbers = #tpu.dot_dimension_numbers<[1], [0], [0], [1], [0, 0, 1, 1], [], []>} : vector<16x41xbf16>, vector<41x512xbf16>, vector<16x512xf32> -> vector<16x512xf32>
    %3 = vector.extract_strided_slice %2 {offsets = [0, 0], sizes = [8, 512], strides = [1, 1]} : vector<16x512xf32> to vector<8x512xf32>
    %4 = vector.shape_cast %3 : vector<8x512xf32> to vector<8x2x256xf32>
    %5 = vector.extract_strided_slice %2 {offsets = [8, 0], sizes = [8, 512], strides = [1, 1]} : vector<16x512xf32> to vector<8x512xf32>
    %6 = vector.shape_cast %5 : vector<8x512xf32> to vector<8x2x256xf32>
    %cst_3 = arith.constant dense<0.000000e+00> : vector<8x2xf32>
    %7 = vector.multi_reduction <add>, %4, %cst_3 [2] : vector<8x2x256xf32> to vector<8x2xf32>
    %8 = vector.shape_cast %7 : vector<8x2xf32> to vector<8x2x1xf32>
    %cst_4 = arith.constant 2.560000e+02 : f32
    %9 = vector.broadcast %cst_4 : f32 to vector<8x2x1xf32>
    %10 = arith.divf %8, %9 : vector<8x2x1xf32>
    %11 = vector.broadcast %10 : vector<8x2x1xf32> to vector<8x2x256xf32>
    %12 = arith.subf %4, %11 : vector<8x2x256xf32>
    %13 = arith.mulf %12, %12 : vector<8x2x256xf32>
    %cst_5 = arith.constant dense<0.000000e+00> : vector<8x2xf32>
    %14 = vector.multi_reduction <add>, %13, %cst_5 [2] : vector<8x2x256xf32> to vector<8x2xf32>
    %15 = vector.shape_cast %14 : vector<8x2xf32> to vector<8x2x1xf32>
    %cst_6 = arith.constant 2.560000e+02 : f32
    %16 = vector.broadcast %cst_6 : f32 to vector<8x2x1xf32>
    %17 = arith.divf %15, %16 : vector<8x2x1xf32>
    %cst_7 = arith.constant 9.99999974E-6 : f32
    %18 = vector.broadcast %cst_7 : f32 to vector<8x2x1xf32>
    %19 = arith.addf %17, %18 : vector<8x2x1xf32>
    %20 = math.rsqrt %19 : vector<8x2x1xf32>
    %21 = vector.broadcast %20 : vector<8x2x1xf32> to vector<8x2x256xf32>
    %22 = arith.mulf %12, %21 : vector<8x2x256xf32>
    %cst_8 = arith.constant 0.000000e+00 : f32
    %23 = vector.broadcast %cst_8 : f32 to vector<8x2x256xf32>
    %24 = arith.maximumf %22, %23 : vector<8x2x256xf32>
    %25 = arith.addf %24, %6 : vector<8x2x256xf32>
    %26 = tpu.transpose %25, [1, 0, 2] : vector<8x2x256xf32> -> vector<2x8x256xf32>
    %27 = vector.shape_cast %26 : vector<2x8x256xf32> to vector<16x256xf32>
    %28 = arith.truncf %27 : vector<16x256xf32> to vector<16x256xbf16>
    %c0_9 = arith.constant 0 : index
    %c0_10 = arith.constant 0 : index
    %29 = vector.load %arg2[%c0_9, %c0_10] : memref<256x1024xbf16, #tpu.memory_space<vmem>>, vector<256x1024xbf16>
    %cst_11 = arith.constant dense<0.000000e+00> : vector<16x1024xf32>
    %30 = tpu.matmul %28, %29, %cst_11 {dimension_numbers = #tpu.dot_dimension_numbers<[1], [0], [0], [1], [0, 0, 1, 1], [], []>} : vector<16x256xbf16>, vector<256x1024xbf16>, vector<16x1024xf32> -> vector<16x1024xf32>
    %cst_12 = arith.constant dense<0.000000e+00> : vector<16xf32>
    %31 = vector.multi_reduction <add>, %30, %cst_12 [1] : vector<16x1024xf32> to vector<16xf32>
    %32 = vector.shape_cast %31 : vector<16xf32> to vector<16x1xf32>
    %cst_13 = arith.constant 1.024000e+03 : f32
    %33 = vector.broadcast %cst_13 : f32 to vector<16x1xf32>
    %34 = arith.divf %32, %33 : vector<16x1xf32>
    %35 = vector.broadcast %34 : vector<16x1xf32> to vector<16x1024xf32>
    %36 = arith.subf %30, %35 : vector<16x1024xf32>
    %37 = arith.mulf %36, %36 : vector<16x1024xf32>
    %cst_14 = arith.constant dense<0.000000e+00> : vector<16xf32>
    %38 = vector.multi_reduction <add>, %37, %cst_14 [1] : vector<16x1024xf32> to vector<16xf32>
    %39 = vector.shape_cast %38 : vector<16xf32> to vector<16x1xf32>
    %cst_15 = arith.constant 1.024000e+03 : f32
    %40 = vector.broadcast %cst_15 : f32 to vector<16x1xf32>
    %41 = arith.divf %39, %40 : vector<16x1xf32>
    %cst_16 = arith.constant 9.99999974E-6 : f32
    %42 = vector.broadcast %cst_16 : f32 to vector<16x1xf32>
    %43 = arith.addf %41, %42 : vector<16x1xf32>
    %44 = math.rsqrt %43 : vector<16x1xf32>
    %45 = vector.broadcast %44 : vector<16x1xf32> to vector<16x1024xf32>
    %46 = arith.mulf %36, %45 : vector<16x1024xf32>
    %cst_17 = arith.constant 0.000000e+00 : f32
    %47 = vector.broadcast %cst_17 : f32 to vector<16x1024xf32>
    %48 = arith.maximumf %46, %47 : vector<16x1024xf32>
    %c0_18 = arith.constant 0 : index
    %c0_19 = arith.constant 0 : index
    %49 = vector.load %arg3[%c0_18, %c0_19] : memref<16x1024xf32, #tpu.memory_space<vmem>>, vector<16x1024xf32>
    tpu.vector_store %arg3[%c0_18, %c0_19], %48 {strides = array<i32>} : memref<16x1024xf32, #tpu.memory_space<vmem>>, vector<16x1024xf32>,
    return
  }
}

</mosaic_0001>

<bundles_post_ra>
// kernel: upsample_forward.1
= control target key start
LH: loop header
LB: loop body
LE: loop exit
PB: predicated region body
PF: predicated region fallthrough
CT: control target
= control target key end

     0   :  { %vm94_vm0 = vcmask 1043456   ;;  %vm95_vm1 = vcmask 1044480   ;;  %v2612_v2 = vmov 65535   ;;  %vm90_vm2 = vcmask 334848   ;;  %s4171_s0 = inlined_call_operand.vmem [shape: bf16[41,512], index: 0, kind: input, shape index: {}]   ;;  %s4172_s1 = inlined_call_operand.vmem [shape: bf16[16,41], index: 1, kind: input, shape index: {}]   ;;  %s4173_s2 = inlined_call_operand.vmem [shape: bf16[256,1024], index: 2, kind: input, shape index: {}]   ;;  %s4174_s3 = inlined_call_operand.vmem [shape: f32[16,1024], index: 3, kind: output, shape index: {}]  }
   0x1   :  { %v1912_v0 = vld [vmem:[%s4171_s0 + $0x40] sm:$0xf]  ;;  %v2453_v1 = vld [vmem:[%s4171_s0 + $0x4c] sm:$0x10]  ;;  %v96_v3 = vsel %vm94_vm0, 4294967295, %v2612_v2  ;;  %vm167_vm3 = vcmask 1047556  }
   0x2   :  { %v1913_v4 = vor.u32 %v2453_v1, %v1912_v0  ;;  %v97_v5 = vsel %vm95_vm1, %v96_v3, 0  ;;  %v2451_v6 = vld [vmem:[%s4171_s0 + $0x44] sm:$0xf]  ;;  %v1914_v7 = vld [vmem:[%s4171_s0 + $0x50] sm:$0x10]  ;;  %vm375_vm4 = vcmask 1041408  }
   0x3   :  { %v1917_v8 = vor.u32 %v2451_v6, %v1914_v7  ;;  %v1920_v9 = vld [vmem:[%s4171_s0 + $0x48] sm:$0xf]  ;;  %v2454_v10 = vld [vmem:[%s4171_s0 + $0x54] sm:$0x10]  ;;  %v2452_v11 = vld [vmem:[%s4171_s0 + $0x4c] sm:$0xf] }
   0x4   :  { %v99_v12 = vand.u32 %v1913_v4, %v97_v5  ;;  %v1921_v13 = vor.u32 %v2454_v10, %v1920_v9  ;;  %v1922_v14 = vld [vmem:[%s4171_s0 + $0x58] sm:$0x10]  ;;  %v1896_v15 = vld [vmem:[%s4171_s0 + $0x20] sm:$0xf]  ;;  %v2449_v16 = vld [vmem:[%s4171_s0 + $0x2c] sm:$0xf0] }
   0x5   :  { %v102_v17 = vand.u32 %v1917_v8, %v97_v5  ;;  %v1925_v18 = vor.u32 %v2452_v11, %v1922_v14  ;;  %v2447_v19 = vld [vmem:[%s4171_s0 + $0x24] sm:$0xf]  ;;  %v1898_v20 = vld [vmem:[%s4171_s0 + $0x30] sm:$0xf0]  ;;  %v1904_v21 = vld [vmem:[%s4171_s0 + $0x28] sm:$0xf]  ;;  %v1897_v23 = vor.u32 %v2449_v16, %v1896_v15 }
   0x6   :  { %115 = vmatpush.bf16.msra.mxu0 %v99_v12  ;;  %v105_v22 = vand.u32 %v1921_v13, %v97_v5  ;;  %v2450_v24 = vld [vmem:[%s4171_s0 + $0x34] sm:$0xf0]  ;;  %v2448_v25 = vld [vmem:[%s4171_s0 + $0x2c] sm:$0xf]  ;;  %v1906_v26 = vld [vmem:[%s4171_s0 + $0x38] sm:$0xf0]  ;;  %v1901_v28 = vor.u32 %v2447_v19, %v1898_v20 }
   0x7   :  { %129 = vmatpush.bf16.msra.mxu1 %v102_v17  ;;  %v108_v27 = vand.u32 %v1925_v18, %v97_v5  ;;  %v1880_v29 = vld [vmem:[%s4171_s0] sm:$0xf]  ;;  %v2445_v30 = vld [vmem:[%s4171_s0 + $0xc] sm:$0xf0]  ;;  %v1905_v31 = vor.u32 %v2450_v24, %v1904_v21  ;;  %v2443_v32 = vld [vmem:[%s4171_s0 + $0x4] sm:$0xf]  ;;  %v1909_v34 = vor.u32 %v2448_v25, %v1906_v26 }
   0x8   :  { %143 = vmatpush.bf16.msra.mxu2 %v105_v22  ;;  %v1882_v33 = vld [vmem:[%s4171_s0 + $0x10] sm:$0xf0]  ;;  %v1888_v35 = vld [vmem:[%s4171_s0 + $0x8] sm:$0xf]  ;;  %v2446_v36 = vld [vmem:[%s4171_s0 + $0x14] sm:$0xf0]  ;;  %v1881_v37 = vor.u32 %v2445_v30, %v1880_v29 }
   0x9   :  { %157 = vmatpush.bf16.msra.mxu3 %v108_v27  ;;  %v2444_v38 = vld [vmem:[%s4171_s0 + $0xc] sm:$0xf]  ;;  %v1890_v39 = vld [vmem:[%s4171_s0 + $0x18] sm:$0xf0]  ;;  %v1885_v40 = vor.u32 %v2443_v32, %v1882_v33  ;;  %v1889_v41 = vor.u32 %v2446_v36, %v1888_v35  ;;  %v2442_v43 = vld [vmem:[%s4172_s1] sm:$0xff] }
   0xa   :  { %116 = vmatpush.bf16.msra.mxu0 %v1897_v23  ;;  %v1893_v42 = vor.u32 %v2444_v38, %v1890_v39  ;;  %v2613_v44 = vmov 1983009808   ;;  %v2614_v52 = vmov 1934713408  }
   0xb   :  { %130 = vmatpush.bf16.msra.mxu1 %v1901_v28  ;;  %v170_v45 = vunpack.c.l.s4 %v2613_v44  ;;  %v192_v53 = vunpack.c.l.s4 %v2614_v52 }
   0xc   :  { %144 = vmatpush.bf16.msra.mxu2 %v1905_v31 }
   0xd   :  { %158 = vmatpush.bf16.msra.mxu3 %v1909_v34  ;;  %v2712_v46 = vunpack.c.0.s8 %v170_v45  ;;  %v2718_v60 = vunpack.c.0.s8 %v192_v53 }
   0xe   :  { %117 = vmatpush.bf16.msra.mxu0 %v1881_v37 }
   0xf   :  { %131 = vmatpush.bf16.msra.mxu1 %v1885_v40 }
  0x10   :  { %145 = vmatpush.bf16.msra.mxu2 %v1889_v41 }
  0x11   :  { %159 = vmatpush.bf16.msra.mxu3 %v1893_v42  ;;  %1926 = vmatmul.msk.bf16.vlgmr.msra.gmra.mxu0 %vm90_vm2, %v2442_v43 }
  0x12   :  { %1927 = vmatmul.msk.bf16.vlgmr.msra.gmra.mxu1 %vm90_vm2, %v2442_v43 }
  0x13   :  { %1928 = vmatmul.msk.bf16.vlgmr.msra.gmra.mxu2 %vm90_vm2, %v2442_v43 }
  0x14   :  { %1929 = vmatmul.msk.bf16.vlgmr.msra.gmra.mxu3 %vm90_vm2, %v2442_v43 }
  0x8e   :  { %v119_v47 = vpop.f32.mrf.mxu0 }
  0x8f   :  { %v133_v48 = vpop.f32.mrf.mxu1  ;;  %v172_v49 = vperm.slane %v119_v47, %v2712_v46  ;;  %v166_v61 = vrot.slane %v119_v47, 4 }
  0x90   :  { %v224_v50 = vperm.slane %v133_v48, %v2712_v46  ;;  %v219_v62 = vrot.slane %v133_v48, 4 }
  0x91   :  { %v189_v54 = vrot.slane %v172_v49, 4  ;;  %v168_v6 = vsel %vm167_vm3, 0.0, %v166_v61 }
  0x92   :  { %v241_v55 = vrot.slane %v224_v50, 4  ;;  %v220_v7 = vsel %vm167_vm3, 0.0, %v219_v62  ;;  %v176_v13 = vperm.slane %v168_v6, %v2712_v46 }
  0x93   :  { %v228_v14 = vperm.slane %v220_v7, %v2712_v46 }
  0x94   :  { %v201_v21 = vrot.slane %v176_v13, 4 }
  0x95   :  { %v253_v22 = vrot.slane %v228_v14, 4 }
  0x96   :  { %v147_v51 = vpop.f32.mrf.mxu2 }
  0x97   :  { %v182_v56 = vperm.slane %v147_v51, %v2712_v46  ;;  %v161_v57 = vpop.f32.mrf.mxu3  ;;  %v177_v1 = vrot.slane %v147_v51, 4 }
  0x98   :  { %v234_v58 = vperm.slane %v161_v57, %v2712_v46  ;;  %v229_v3 = vrot.slane %v161_v57, 4 }
  0x99   :  { %v187_v59 = vrot.slane %v182_v56, 4  ;;  %v190_v63 = vsel %vm167_vm3, %v182_v56, %v189_v54  ;;  %v178_v9 = vsel %vm167_vm3, 0.0, %v177_v1 }
  0x9a   :  { %v242_v0 = vsel %vm167_vm3, %v234_v58, %v241_v55  ;;  %v2724_v4 = vperm.slane %v190_v63, %v2718_v60  ;;  %v239_v8 = vrot.slane %v234_v58, 4  ;;  %v230_v15 = vsel %vm167_vm3, 0.0, %v229_v3 }
  0x9b   :  { %v188_v2 = vsel %vm167_vm3, %v187_v59, %v172_v49  ;;  %v2727_v5 = vperm.slane %v242_v0, %v2718_v60  ;;  %v186_v16 = vperm.slane %v178_v9, %v2712_v46  ;;  %v238_v19 = vperm.slane %v230_v15, %v2712_v46 }
  0x9c   :  { %v386_v10 = vsel %vm375_vm4, %v2724_v4, 0.0  ;;  %v2737_v12 = vperm.slane %v188_v2, %v2718_v60  ;;  %v240_v17 = vsel %vm167_vm3, %v239_v8, %v224_v50  ;;  %v213_v26 = vrot.slane %v2724_v4, 4 }
  0x9d   :  { %v387_v11 = vsel %vm375_vm4, %v2727_v5, 0.0  ;;  %v2747_v23 = vperm.slane %v240_v17, %v2718_v60  ;;  %v199_v24 = vrot.slane %v186_v16, 4  ;;  %v251_v25 = vrot.slane %v238_v19, 4 }
  0x9e   :  { %v388_v18 = vadd.f32 %v387_v11, %v386_v10  ;;  %v211_v20 = vrot.slane %v2737_v12, 4  ;;  %v265_v27 = vrot.slane %v2727_v5, 4  ;;  %v202_v29 = vsel %vm167_vm3, %v186_v16, %v201_v21 }
  0x9f   :  { %v254_v30 = vsel %vm167_vm3, %v238_v19, %v253_v22  ;;  %v263_v31 = vrot.slane %v2747_v23, 4  ;;  %v2758_v32 = vsel %vm167_vm3, 0.0, %v213_v26  ;;  %v200_v35 = vsel %vm167_vm3, %v199_v24, %v176_v13 }
  0xa0   :  { %389 = vadd.xlane.f32.xlu1 %v388_v18  ;;  %v2752_v28 = vsel %vm167_vm3, 0.0, %v211_v20  ;;  %v2761_v33 = vsel %vm167_vm3, 0.0, %v265_v27  ;;  %v391_v36 = vsel %vm375_vm4, %v2758_v32, 0.0  ;;  %v2774_v39 = vperm.slane %v200_v35, %v2718_v60 }
  0xa1   :  { %v381_v34 = vsel %vm375_vm4, %v2752_v28, 0.0  ;;  %v392_v37 = vsel %vm375_vm4, %v2761_v33, 0.0  ;;  %v2771_v38 = vsel %vm167_vm3, 0.0, %v263_v31  ;;  %v252_v42 = vsel %vm167_vm3, %v251_v25, %v228_v14 }
  0xa2   :  { %v393_v40 = vadd.f32 %v392_v37, %v391_v36  ;;  %v382_v41 = vsel %vm375_vm4, %v2771_v38, 0.0  ;;  %v2780_v43 = vperm.slane %v202_v29, %v2718_v60  ;;  %v215_v45 = vrot.slane %v2774_v39, 4 }
  0xa3   :  { %v383_v44 = vadd.f32 %v382_v41, %v381_v34  ;;  %v2784_v47 = vperm.slane %v252_v42, %v2718_v60  ;;  %v2787_v48 = vperm.slane %v254_v30, %v2718_v60  ;;  %v396_v61 = vsel %vm375_vm4, %v2774_v39, 0.0 }
  0xa4   :  { %394 = vadd.xlane.f32.xlu0 %v393_v40  ;;  %v217_v49 = vrot.slane %v2780_v43, 4  ;;  %v2791_v50 = vsel %vm167_vm3, 0.0, %v215_v45  ;;  %v406_v2 = vsel %vm375_vm4, %v2780_v43, 0.0  ;;  %v376_v6 = vsel %vm375_vm4, %v2737_v12, 0.0 }
  0xa5   :  { %v267_v51 = vrot.slane %v2784_v47, 4  ;;  %v269_v52 = vrot.slane %v2787_v48, 4  ;;  %v401_v53 = vsel %vm375_vm4, %v2791_v50, 0.0  ;;  %v397_v62 = vsel %vm375_vm4, %v2784_v47, 0.0 }
  0xa6   :  { %v2798_v54 = vsel %vm167_vm3, 0.0, %v217_v49  ;;  %v398_v1 = vadd.f32 %v397_v62, %v396_v61  ;;  %v407_v3 = vsel %vm375_vm4, %v2787_v48, 0.0  ;;  %v377_v7 = vsel %vm375_vm4, %v2747_v23, 0.0 }
  0xa7   :  { %v2801_v55 = vsel %vm167_vm3, 0.0, %v267_v51  ;;  %v2804_v56 = vsel %vm167_vm3, 0.0, %v269_v52  ;;  %v411_v57 = vsel %vm375_vm4, %v2798_v54, 0.0  ;;  %v408_v8 = vadd.f32 %v407_v3, %v406_v2 }
  0xa8   :  { %384 = vadd.xlane.f32.xlu1 %v383_v44  ;;  %v402_v58 = vsel %vm375_vm4, %v2801_v55, 0.0  ;;  %v412_v59 = vsel %vm375_vm4, %v2804_v56, 0.0  ;;  %v378_v9 = vadd.f32 %v377_v7, %v376_v6  ;;  %v2615_v10 = vmov 256.0  }
  0xa9   :  { %v403_v63 = vadd.f32 %v402_v58, %v401_v53  ;;  %v413_v0 = vadd.f32 %v412_v59, %v411_v57  ;;  %2588 = vrcp.f32 %v2615_v10 }
  0xab   :  { %404 = vadd.xlane.f32.xlu2 %v403_v63 }
  0xac   :  { %414 = vadd.xlane.f32.xlu0 %v413_v0 }
  0xaf   :  { %v2589_v11 = vpop.eup %2588 }
  0xb0   :  { %399 = vadd.xlane.f32.xlu1 %v398_v1  ;;  %v417_v13 = vmul.f32 256.0, %v2589_v11  ;;  %vm421_vm5 = vweird.f32 %v2589_v11 }
  0xb2   :  { %v418_v14 = vsub.f32 1.0, %v417_v13 }
  0xb3   :  { %409 = vadd.xlane.f32.xlu2 %v408_v8 }
  0xb4   :  { %379 = vadd.xlane.f32.xlu0 %v378_v9  ;;  %v419_v15 = vmul.f32 %v2589_v11, %v418_v14 }
  0xb6   :  { %v420_v16 = vadd.f32 %v2589_v11, %v419_v15 }
  0xb8   :  { %v2824_v17 = vsel %vm421_vm5, %v2589_v11, %v420_v16 }
 0x113   :  { %v390_v18 = vpop.xlane.xlu1 %389 }
 0x114   :  { %v425_v19 = vmul.f32 %v2824_v17, %v390_v18 }
 0x116   :  { %v2828_v20 = vsub.f32 %v2724_v4, %v425_v19  ;;  %v2831_v21 = vsub.f32 %v2727_v5, %v425_v19 }
 0x117   :  { %v395_v29 = vpop.xlane.xlu0 %394 }
 0x118   :  { %v451_v22 = vmul.f32 %v2828_v20, %v2828_v20  ;;  %v452_v24 = vmul.f32 %v2831_v21, %v2831_v21  ;;  %v426_v30 = vmul.f32 %v2824_v17, %v395_v29 }
 0x11a   :  { %v473_v25 = vsel %vm375_vm4, %v451_v22, 0.0  ;;  %v474_v26 = vsel %vm375_vm4, %v452_v24, 0.0  ;;  %v2842_v5 = vsub.f32 %v2758_v32, %v426_v30  ;;  %v2845_v34 = vsub.f32 %v2761_v33, %v426_v30 }
 0x11b   :  { %v475_v27 = vadd.f32 %v474_v26, %v473_v25  ;;  %v385_v4 = vpop.xlane.xlu1 %384 }
 0x11c   :  { %v424_v31 = vmul.f32 %v2824_v17, %v385_v4  ;;  %v453_v37 = vmul.f32 %v2842_v5, %v2842_v5  ;;  %v454_v40 = vmul.f32 %v2845_v34, %v2845_v34 }
 0x11d   :  { %476 = vadd.xlane.f32.xlu2 %v475_v27 }
 0x11e   :  { %v2848_v35 = vsub.f32 %v2752_v28, %v424_v31  ;;  %v2851_v36 = vsub.f32 %v2771_v38, %v424_v31  ;;  %v405_v33 = vpop.xlane.xlu2 %404  ;;  %v478_v42 = vsel %vm375_vm4, %v453_v37, 0.0  ;;  %v479_v28 = vsel %vm375_vm4, %v454_v40, 0.0  ;;  %v121_v37 = vpop.f32.mrf.mxu0 }
 0x11f   :  { %v415_v44 = vpop.xlane.xlu0 %414  ;;  %v480_v49 = vadd.f32 %v479_v28, %v478_v42  ;;  %v428_v51 = vmul.f32 %v2824_v17, %v405_v33  ;;  %v271_v40 = vrot.slane %v121_v37, 4  ;;  %v2156_v42 = vld [vmem:[%s4173_s2 + $0x1c0] sm:$0xf] }
 0x120   :  { %v449_v41 = vmul.f32 %v2848_v35, %v2848_v35  ;;  %v450_v32 = vmul.f32 %v2851_v36, %v2851_v36  ;;  %v430_v52 = vmul.f32 %v2824_v17, %v415_v44  ;;  %v2515_v28 = vld [vmem:[%s4173_s2 + $0x1dc] sm:$0xf0] }
 0x121   :  { %v2874_v59 = vsub.f32 %v2791_v50, %v428_v51  ;;  %v2877_v61 = vsub.f32 %v2801_v55, %v428_v51  ;;  %v2412_v44 = vld [vmem:[%s4173_s2 + $0x3c0] sm:$0xf]  ;;  %v2158_v51 = vld [vmem:[%s4173_s2 + $0x1e0] sm:$0xf0] }
 0x122   :  { %v468_v38 = vsel %vm375_vm4, %v449_v41, 0.0  ;;  %v469_v45 = vsel %vm375_vm4, %v450_v32, 0.0  ;;  %v2868_v57 = vsub.f32 %v2798_v54, %v430_v52  ;;  %v2871_v58 = vsub.f32 %v2804_v56, %v430_v52  ;;  %v135_v41 = vpop.f32.mrf.mxu1 }
 0x123   :  { %v470_v53 = vadd.f32 %v469_v45, %v468_v38  ;;  %v400_v62 = vpop.xlane.xlu1 %399  ;;  %v457_v7 = vmul.f32 %v2874_v59, %v2874_v59  ;;  %v458_v8 = vmul.f32 %v2877_v61, %v2877_v61  ;;  %v272_v32 = vsel %vm167_vm3, 0.0, %v271_v40  ;;  %v2579_v45 = vld [vmem:[%s4173_s2 + $0x3dc] sm:$0xf0]  ;;  %v2094_v40 = vld [vmem:[%s4173_s2 + $0x160] sm:$0xf0] }
 0x124   :  { %v461_v63 = vmul.f32 %v2868_v57, %v2868_v57  ;;  %v462_v0 = vmul.f32 %v2871_v58, %v2871_v58  ;;  %v427_v2 = vmul.f32 %v2824_v17, %v400_v62  ;;  %v323_v33 = vrot.slane %v135_v41, 4 }
 0x125   :  { %481 = vadd.xlane.f32.xlu2 %v480_v49  ;;  %471 = vadd.xlane.f32.xlu1 %v470_v53  ;;  %v2157_v38 = vor.u32 %v2515_v28, %v2156_v42  ;;  %v2511_v49 = vld [vmem:[%s4173_s2 + $0x1c4] sm:$0xf]  ;;  %v2950_v52 = vperm.slane %v121_v37, %v2712_v46  ;;  %v2953_v53 = vperm.slane %v272_v32, %v2712_v46 }
 0x126   :  { %v410_v1 = vpop.xlane.xlu2 %409  ;;  %v498_v54 = vsel %vm375_vm4, %v461_v63, 0.0  ;;  %v499_v56 = vsel %vm375_vm4, %v462_v0, 0.0  ;;  %v2905_v14 = vsub.f32 %v2774_v39, %v427_v2  ;;  %v2908_v15 = vsub.f32 %v2784_v47, %v427_v2  ;;  %v2575_v0 = vld [vmem:[%s4173_s2 + $0x3c4] sm:$0xf]  ;;  %v149_v2 = vpop.f32.mrf.mxu2 }
 0x127   :  { %v429_v50 = vmul.f32 %v2824_v17, %v410_v1  ;;  %v380_v3 = vpop.xlane.xlu0 %379  ;;  %v500_v6 = vadd.f32 %v499_v56, %v498_v54  ;;  %v489_v39 = vsel %vm375_vm4, %v458_v8, 0.0  ;;  %v2413_v62 = vor.u32 %v2579_v45, %v2412_v44  ;;  %v2414_v1 = vld [vmem:[%s4173_s2 + $0x3e0] sm:$0xf0]  ;;  %1497 = vmatpush.bf16.msrb.mxu0 %v2157_v38  ;;  %v2571_v8 = vld [vmem:[%s4173_s2 + $0x39c] sm:$0xf0] }
 0x128   :  { %v423_v55 = vmul.f32 %v2824_v17, %v380_v3  ;;  %v455_v27 = vmul.f32 %v2905_v14, %v2905_v14  ;;  %v456_v29 = vmul.f32 %v2908_v15, %v2908_v15  ;;  %v2161_v63 = vor.u32 %v2511_v49, %v2158_v51  ;;  %v2507_v3 = vld [vmem:[%s4173_s2 + $0x19c] sm:$0xf0]  ;;  %v2495_v37 = vld [vmem:[%s4173_s2 + $0x144] sm:$0xf] }
 0x129   :  { %v2893_v9 = vsub.f32 %v2780_v43, %v429_v50  ;;  %v2896_v10 = vsub.f32 %v2787_v48, %v429_v50  ;;  %501 = vadd.xlane.f32.xlu0 %v500_v6  ;;  %v324_v54 = vsel %vm167_vm3, 0.0, %v323_v33  ;;  %v2417_v56 = vor.u32 %v2575_v0, %v2414_v1  ;;  %1511 = vmatpush.bf16.msrb.mxu1 %v2413_v62  ;;  %v2124_v50 = vld [vmem:[%s4173_s2 + $0x180] sm:$0xf]  ;;  %v2559_v28 = vld [vmem:[%s4173_s2 + $0x344] sm:$0xf] }
 0x12a   :  { %v2899_v11 = vsub.f32 %v2737_v12, %v423_v55  ;;  %v2902_v13 = vsub.f32 %v2747_v23, %v423_v55  ;;  %v488_v23 = vsel %vm375_vm4, %v457_v7, 0.0  ;;  %v483_v30 = vsel %vm375_vm4, %v455_v27, 0.0  ;;  %1525 = vmatpush.bf16.msrb.mxu2 %v2161_v63  ;;  %v2380_v6 = vld [vmem:[%s4173_s2 + $0x380] sm:$0xf]  ;;  %v2350_v44 = vld [vmem:[%s4173_s2 + $0x360] sm:$0xf0] }
 0x12b   :  { %v459_v43 = vmul.f32 %v2893_v9, %v2893_v9  ;;  %v460_v48 = vmul.f32 %v2896_v10, %v2896_v10  ;;  %v490_v26 = vadd.f32 %v489_v39, %v488_v23  ;;  %v484_v4 = vsel %vm375_vm4, %v456_v29, 0.0  ;;  %1539 = vmatpush.bf16.msrb.mxu3 %v2417_v56  ;;  %v2092_v27 = vld [vmem:[%s4173_s2 + $0x140] sm:$0xf] }
 0x12c   :  { %v447_v16 = vmul.f32 %v2899_v11, %v2899_v11  ;;  %v448_v12 = vmul.f32 %v2902_v13, %v2902_v13  ;;  %v485_v31 = vadd.f32 %v484_v4, %v483_v30  ;;  %v2972_v55 = vperm.slane %v135_v41, %v2712_v46  ;;  %v2499_v29 = vld [vmem:[%s4173_s2 + $0x15c] sm:$0xf0] }
 0x12d   :  { %v493_v18 = vsel %vm375_vm4, %v459_v43, 0.0  ;;  %v494_v47 = vsel %vm375_vm4, %v460_v48, 0.0  ;;  %v2125_v7 = vor.u32 %v2507_v3, %v2124_v50  ;;  %v2503_v43 = vld [vmem:[%s4173_s2 + $0x184] sm:$0xf]  ;;  %v2381_v23 = vor.u32 %v2571_v8, %v2380_v6  ;;  %v2348_v30 = vld [vmem:[%s4173_s2 + $0x340] sm:$0xf] }
 0x12e   :  { %v495_v19 = vadd.f32 %v494_v47, %v493_v18  ;;  %v463_v22 = vsel %vm375_vm4, %v447_v16, 0.0  ;;  %v464_v24 = vsel %vm375_vm4, %v448_v12, 0.0  ;;  %v2126_v48 = vld [vmem:[%s4173_s2 + $0x1a0] sm:$0xf0]  ;;  %v293_v16 = vrot.slane %v2950_v52, 4 }
 0x12f   :  { %v465_v25 = vadd.f32 %v464_v24, %v463_v22  ;;  %v305_v12 = vrot.slane %v2953_v53, 4  ;;  %v2129_v39 = vor.u32 %v2503_v43, %v2126_v48  ;;  %v2567_v18 = vld [vmem:[%s4173_s2 + $0x384] sm:$0xf]  ;;  %v281_v22 = vrot.slane %v149_v2, 4  ;;  %1498 = vmatpush.bf16.msrb.mxu0 %v2125_v7  ;;  %1512 = vmatpush.bf16.msrb.mxu1 %v2381_v23  ;;  %v2060_v0 = vld [vmem:[%s4173_s2 + $0x100] sm:$0xf] }
 0x130   :  { %496 = vadd.xlane.f32.xlu1 %v495_v19  ;;  %v2382_v47 = vld [vmem:[%s4173_s2 + $0x3a0] sm:$0xf0]  ;;  %v2992_v19 = vperm.slane %v324_v54, %v2712_v46  ;;  %v286_v24 = vperm.slane %v149_v2, %v2712_v46  ;;  %v2093_v4 = vor.u32 %v2499_v29, %v2092_v27  ;;  %v345_v41 = vrot.slane %v2972_v55, 4  ;;  %v2491_v1 = vld [vmem:[%s4173_s2 + $0x11c] sm:$0xf0] }
 0x131   :  { %466 = vadd.xlane.f32.xlu2 %v465_v25  ;;  %491 = vadd.xlane.f32.xlu0 %v490_v26  ;;  %v163_v25 = vpop.f32.mrf.mxu3  ;;  %v2385_v26 = vor.u32 %v2567_v18, %v2382_v47  ;;  %v2097_v42 = vor.u32 %v2495_v37, %v2094_v40  ;;  %v282_v45 = vsel %vm167_vm3, 0.0, %v281_v22  ;;  %v2353_v62 = vor.u32 %v2559_v28, %v2350_v44  ;;  %v2316_v54 = vld [vmem:[%s4173_s2 + $0x300] sm:$0xf]  ;;  %v2487_v50 = vld [vmem:[%s4173_s2 + $0x104] sm:$0xf] }
 0x132   :  { %1526 = vmatpush.bf16.msrb.mxu2 %v2129_v39  ;;  %v333_v32 = vrot.slane %v163_v25, 4  ;;  %v357_v38 = vrot.slane %v2992_v19, 4  ;;  %v291_v49 = vrot.slane %v286_v24, 4  ;;  %v2061_v56 = vor.u32 %v2491_v1, %v2060_v0  ;;  %v2555_v2 = vld [vmem:[%s4173_s2 + $0x31c] sm:$0xf0] }
 0x133   :  { %1540 = vmatpush.bf16.msrb.mxu3 %v2385_v26  ;;  %1499 = vmatpush.bf16.msrb.mxu0 %v2093_v4  ;;  %v2062_v3 = vld [vmem:[%s4173_s2 + $0x120] sm:$0xf0]  ;;  %v3042_v6 = vperm.slane %v163_v25, %v2712_v46  ;;  %v2317_v8 = vor.u32 %v2555_v2, %v2316_v54  ;;  %v3053_v39 = vperm.slane %v282_v45, %v2712_v46  ;;  %v2028_v25 = vld [vmem:[%s4173_s2 + $0xc0] sm:$0xf] }
 0x134   :  { %v2065_v43 = vor.u32 %v2487_v50, %v2062_v3  ;;  %v2551_v48 = vld [vmem:[%s4173_s2 + $0x304] sm:$0xf]  ;;  %v294_v18 = vsel %vm167_vm3, %v286_v24, %v293_v16  ;;  %v334_v47 = vsel %vm167_vm3, 0.0, %v333_v32  ;;  %v2483_v26 = vld [vmem:[%s4173_s2 + $0xdc] sm:$0xf0]  ;;  %v292_v4 = vsel %vm167_vm3, %v291_v49, %v2950_v52 }
 0x135   :  { %v2318_v23 = vld [vmem:[%s4173_s2 + $0x320] sm:$0xf0]  ;;  %v2284_v16 = vld [vmem:[%s4173_s2 + $0x2c0] sm:$0xf]  ;;  %v2029_v24 = vor.u32 %v2483_v26, %v2028_v25  ;;  %v3089_v28 = vperm.slane %v334_v47, %v2712_v46  ;;  %v343_v52 = vrot.slane %v3042_v6, 4 }
 0x136   :  { %1527 = vmatpush.bf16.msrb.mxu2 %v2097_v42  ;;  %v2321_v22 = vor.u32 %v2551_v48, %v2318_v23  ;;  %v2547_v27 = vld [vmem:[%s4173_s2 + $0x2dc] sm:$0xf0]  ;;  %v2479_v29 = vld [vmem:[%s4173_s2 + $0xc4] sm:$0xf]  ;;  %v303_v42 = vrot.slane %v3053_v39, 4 }
 0x137   :  { %1541 = vmatpush.bf16.msrb.mxu3 %v2353_v62  ;;  %1500 = vmatpush.bf16.msrb.mxu0 %v2061_v56  ;;  %v2285_v37 = vor.u32 %v2547_v27, %v2284_v16  ;;  %v2543_v32 = vld [vmem:[%s4173_s2 + $0x2c4] sm:$0xf]  ;;  %v1996_v45 = vld [vmem:[%s4173_s2 + $0x80] sm:$0xf]  ;;  %v3102_v62 = vperm.slane %v292_v4, %v2718_v60  ;;  %v355_v47 = vrot.slane %v3089_v28, 4  ;;  %v346_v16 = vsel %vm167_vm3, %v3042_v6, %v345_v41 }
 0x138   :  { %v2475_v49 = vld [vmem:[%s4173_s2 + $0x9c] sm:$0xf0]  ;;  %v2471_v54 = vld [vmem:[%s4173_s2 + $0x84] sm:$0xf] }
 0x139   :  { %486 = vadd.xlane.f32.xlu0 %v485_v31  ;;  %v2563_v31 = vld [vmem:[%s4173_s2 + $0x35c] sm:$0xf0]  ;;  %v1997_v0 = vor.u32 %v2475_v49, %v1996_v45  ;;  %v1998_v56 = vld [vmem:[%s4173_s2 + $0xa0] sm:$0xf0]  ;;  %v315_v45 = vrot.slane %v3102_v62, 4 }
 0x13a   :  { %v2349_v33 = vor.u32 %v2563_v31, %v2348_v30  ;;  %1528 = vmatpush.bf16.msrb.mxu2 %v2065_v43  ;;  %v2030_v30 = vld [vmem:[%s4173_s2 + $0xe0] sm:$0xf0]  ;;  %v3079_v31 = vperm.slane %v294_v18, %v2718_v60  ;;  %v2539_v1 = vld [vmem:[%s4173_s2 + $0x29c] sm:$0xf0]  ;;  %v2001_v48 = vor.u32 %v2471_v54, %v1998_v56  ;;  %v3173_v54 = vperm.slane %v346_v16, %v2718_v60 }
 0x13b   :  { %1542 = vmatpush.bf16.msrb.mxu3 %v2321_v22  ;;  %v2033_v40 = vor.u32 %v2479_v29, %v2030_v30  ;;  %1501 = vmatpush.bf16.msrb.mxu0 %v2029_v24  ;;  %v2535_v23 = vld [vmem:[%s4173_s2 + $0x284] sm:$0xf]  ;;  %v1964_v27 = vld [vmem:[%s4173_s2 + $0x40] sm:$0xf]  ;;  %v306_v30 = vsel %vm167_vm3, %v3053_v39, %v305_v12 }
 0x13c   :  { %1513 = vmatpush.bf16.msrb.mxu1 %v2349_v33  ;;  %v2286_v33 = vld [vmem:[%s4173_s2 + $0x2e0] sm:$0xf0]  ;;  %v317_v50 = vrot.slane %v3079_v31, 4  ;;  %v2467_v29 = vld [vmem:[%s4173_s2 + $0x5c] sm:$0xf0] }
 0x13d   :  { %v2289_v44 = vor.u32 %v2543_v32, %v2286_v33  ;;  %v2254_v18 = vld [vmem:[%s4173_s2 + $0x2a0] sm:$0xf0]  ;;  %v1965_v6 = vor.u32 %v2467_v29, %v1964_v27 }
 0x13e   :  { %1529 = vmatpush.bf16.msrb.mxu2 %v2033_v40  ;;  %v2257_v26 = vor.u32 %v2535_v23, %v2254_v18  ;;  %v2531_v40 = vld [vmem:[%s4173_s2 + $0x25c] sm:$0xf0]  ;;  %v2463_v12 = vld [vmem:[%s4173_s2 + $0x44] sm:$0xf] }
 0x13f   :  { %1543 = vmatpush.bf16.msrb.mxu3 %v2289_v44  ;;  %1502 = vmatpush.bf16.msrb.mxu0 %v1997_v0  ;;  %v1966_v33 = vld [vmem:[%s4173_s2 + $0x60] sm:$0xf0]  ;;  %v3168_v0 = vperm.slane %v306_v30, %v2718_v60  ;;  %v2523_v18 = vld [vmem:[%s4173_s2 + $0x21c] sm:$0xf0]  ;;  %v2164_v30 = vld [vmem:[%s4173_s2 + $0x1c8] sm:$0xf] }
 0x140   :  { %1514 = vmatpush.bf16.msrb.mxu1 %v2317_v8  ;;  %v2527_v44 = vld [vmem:[%s4173_s2 + $0x244] sm:$0xf] }
 0x141   :  { %v1934_v27 = vld [vmem:[%s4173_s2 + $0x20] sm:$0xf0] }
 0x142   :  { %1530 = vmatpush.bf16.msrb.mxu2 %v2001_v48  ;;  %v3185_v48 = vsel %vm167_vm3, 0.0, %v317_v50  ;;  %v304_v50 = vsel %vm167_vm3, %v303_v42, %v2953_v53  ;;  %v2519_v29 = vld [vmem:[%s4173_s2 + $0x204] sm:$0xf] }
 0x143   :  { %1544 = vmatpush.bf16.msrb.mxu3 %v2257_v26  ;;  %1503 = vmatpush.bf16.msrb.mxu0 %v1965_v6  ;;  %v2190_v39 = vld [vmem:[%s4173_s2 + $0x220] sm:$0xf0]  ;;  %v2420_v6 = vld [vmem:[%s4173_s2 + $0x3c8] sm:$0xf] }
 0x144   :  { %1515 = vmatpush.bf16.msrb.mxu1 %v2285_v37  ;;  %v2220_v37 = vld [vmem:[%s4173_s2 + $0x240] sm:$0xf] }
 0x145   :  { %v2221_v32 = vor.u32 %v2531_v40, %v2220_v37 }
 0x190   :  { %v477_v51 = vpop.xlane.xlu2 %476 }
 0x191   :  { %v505_v63 = vmul.f32 %v477_v51, %v2824_v17  ;;  %v2252_v51 = vld [vmem:[%s4173_s2 + $0x280] sm:$0xf] }
 0x192   :  { %v2253_v43 = vor.u32 %v2539_v1, %v2252_v51  ;;  %v1969_v51 = vor.u32 %v2463_v12, %v1966_v33  ;;  %v344_v1 = vsel %vm167_vm3, %v343_v52, %v2972_v55  ;;  %v2580_v33 = vld [vmem:[%s4173_s2 + $0x3e4] sm:$0xf0] }
 0x193   :  { %v3044_v7 = vadd.f32 1e-05, %v505_v63  ;;  %v3224_v40 = vperm.slane %v344_v1, %v2718_v60  ;;  %v2576_v1 = vld [vmem:[%s4173_s2 + $0x3cc] sm:$0xf] }
 0x194   :  { %1516 = vmatpush.bf16.msrb.mxu1 %v2253_v43  ;;  %v2188_v43 = vld [vmem:[%s4173_s2 + $0x200] sm:$0xf]  ;;  %1531 = vmatpush.bf16.msrb.mxu2 %v1969_v51  ;;  %v2421_v51 = vor.u32 %v2580_v33, %v2420_v6 }
 0x195   :  { %2590 = vrsqrt.f32 %v3044_v7  ;;  %v2189_v16 = vor.u32 %v2523_v18, %v2188_v43  ;;  %vm545_vm7 = vweird.f32 %v3044_v7 }
 0x198   :  { %v482_v63 = vpop.xlane.xlu2 %481  ;;  %v472_v3 = vpop.xlane.xlu1 %471  ;;  %1517 = vmatpush.bf16.msrb.mxu1 %v2221_v32 }
 0x199   :  { %v506_v8 = vmul.f32 %v482_v63, %v2824_v17  ;;  %v504_v25 = vmul.f32 %v472_v3, %v2824_v17  ;;  %v2222_v63 = vld [vmem:[%s4173_s2 + $0x260] sm:$0xf0]  ;;  %v1932_v3 = vld [vmem:[%s4173_s2] sm:$0xf] }
 0x19a   :  { %v2225_v56 = vor.u32 %v2527_v44, %v2222_v63  ;;  %v2512_v44 = vld [vmem:[%s4173_s2 + $0x1cc] sm:$0xf] }
 0x19b   :  { %v3113_v2 = vpop.eup %2590  ;;  %v3131_v24 = vadd.f32 1e-05, %v506_v8  ;;  %v3144_v41 = vadd.f32 1e-05, %v504_v25  ;;  %v2459_v8 = vld [vmem:[%s4173_s2 + $0x1c] sm:$0xf0]  ;;  %v356_v25 = vsel %vm167_vm3, %v355_v47, %v2992_v19  ;;  %v2193_v47 = vor.u32 %v2519_v29, %v2190_v39 }
 0x19c   :  { %v540_v22 = vmul.f32 %v3113_v2, %v3044_v7  ;;  %vm546_vm6 = vweird.f32 %v3113_v2  ;;  %v502_v52 = vpop.xlane.xlu0 %501  ;;  %v1933_v23 = vor.u32 %v2459_v8, %v1932_v3  ;;  %1545 = vmatpush.bf16.msrb.mxu3 %v2225_v56  ;;  %v358_v7 = vsel %vm167_vm3, %v3089_v28, %v357_v38  ;;  %1518 = vmatpush.bf16.msrb.mxu1 %v2189_v16  ;;  %v2166_v63 = vld [vmem:[%s4173_s2 + $0x1e8] sm:$0xf0] }
 0x19d   :  { %2592 = vrsqrt.f32 %v3131_v24  ;;  %v510_v26 = vmul.f32 %v502_v52, %v2824_v17  ;;  %vm547_vm8 = vmor %vm545_vm7, %vm546_vm6  ;;  %v3243_v19 = vperm.slane %v304_v50, %v2718_v60  ;;  %v2422_v56 = vld [vmem:[%s4173_s2 + $0x3e8] sm:$0xf0]  ;;  %v321_v3 = vrot.slane %v3168_v0, 4  ;;  %v2508_v52 = vld [vmem:[%s4173_s2 + $0x1a4] sm:$0xf0] }
 0x19e   :  { %v541_v4 = vmul.f32 %v3113_v2, %v540_v22  ;;  %2594 = vrsqrt.f32 %v3144_v41  ;;  %v2455_v22 = vld [vmem:[%s4173_s2 + $0x4] sm:$0xf]  ;;  %1504 = vmatpush.bf16.msrb.mxu0 %v1933_v23  ;;  %v369_v8 = vrot.slane %v3173_v54, 4  ;;  %v3271_v23 = vperm.slane %v358_v7, %v2718_v60  ;;  %v2388_v50 = vld [vmem:[%s4173_s2 + $0x388] sm:$0xf] }
 0x19f   :  { %v1937_v42 = vor.u32 %v2455_v22, %v1934_v27  ;;  %v3232_v32 = vadd.f32 1e-05, %v510_v26  ;;  %v2169_v22 = vor.u32 %v2512_v44, %v2166_v63  ;;  %v367_v26 = vrot.slane %v3224_v40, 4 }
 0x1a0   :  { %v542_v49 = vmul.f32 0.5, %v541_v4  ;;  %v2516_v4 = vld [vmem:[%s4173_s2 + $0x1e4] sm:$0xf0]  ;;  %1546 = vmatpush.bf16.msrb.mxu3 %v2193_v47  ;;  %1567 = vmatpush.bf16.msra.mxu1 %v2421_v51  ;;  %v2425_v39 = vor.u32 %v2576_v1, %v2422_v56  ;;  %v3293_v33 = vsel %vm167_vm3, 0.0, %v369_v8  ;;  %vm555_vm10 = vweird.f32 %v3131_v24 }
 0x1a1   :  { %v2165_v12 = vor.u32 %v2516_v4, %v2164_v30  ;;  %1532 = vmatpush.bf16.msrb.mxu2 %v1937_v42  ;;  %2596 = vrsqrt.f32 %v3232_v32  ;;  %v2134_v42 = vld [vmem:[%s4173_s2 + $0x1a8] sm:$0xf0]  ;;  %vm535_vm13 = vweird.f32 %v3144_v41  ;;  %vm595_vm0 = vweird.f32 %v3232_v32 }
 0x1a2   :  { %v543_v55 = vsub.f32 1.5, %v542_v49 }
 0x1a3   :  { %v3221_v37 = vpop.eup %2592  ;;  %1553 = vmatpush.bf16.msra.mxu0 %v2165_v12  ;;  %v497_v29 = vpop.xlane.xlu1 %496  ;;  %v319_v12 = vrot.slane %v3243_v19, 4 }
 0x1a4   :  { %v544_v53 = vmul.f32 %v3113_v2, %v543_v55  ;;  %v3240_v49 = vpop.eup %2594  ;;  %v550_v28 = vmul.f32 %v3221_v37, %v3131_v24  ;;  %v2132_v55 = vld [vmem:[%s4173_s2 + $0x188] sm:$0xf]  ;;  %v509_v30 = vmul.f32 %v497_v29, %v2824_v17  ;;  %v492_v4 = vpop.xlane.xlu0 %491  ;;  %1595 = vmatpush.bf16.msra.mxu3 %v2425_v39  ;;  %vm556_vm9 = vweird.f32 %v3221_v37 }
 0x1a5   :  { %v530_v43 = vmul.f32 %v3240_v49, %v3144_v41  ;;  %v467_v6 = vpop.xlane.xlu2 %466  ;;  %1581 = vmatpush.bf16.msra.mxu2 %v2169_v22  ;;  %v2133_v7 = vor.u32 %v2508_v52, %v2132_v55  ;;  %v373_v24 = vrot.slane %v3271_v23, 4  ;;  %v3330_v39 = vsel %vm167_vm3, 0.0, %v315_v45  ;;  %vm557_vm11 = vmor %vm555_vm10, %vm556_vm9  ;;  %v2564_v45 = vld [vmem:[%s4173_s2 + $0x364] sm:$0xf0] }
 0x1a6   :  { %v548_v38 = vsel %vm547_vm8, %v3113_v2, %v544_v53  ;;  %v3259_v2 = vperm.slane %v356_v25, %v2718_v60  ;;  %v551_v18 = vmul.f32 %v3221_v37, %v550_v28  ;;  %v2572_v25 = vld [vmem:[%s4173_s2 + $0x3a4] sm:$0xf0]  ;;  %v2504_v53 = vld [vmem:[%s4173_s2 + $0x18c] sm:$0xf]  ;;  %v508_v28 = vmul.f32 %v492_v4, %v2824_v17 }
 0x1a7   :  { %v603_v16 = vmul.f32 %v548_v38, %v2828_v20  ;;  %v531_v27 = vmul.f32 %v3240_v49, %v530_v43  ;;  %v2389_v20 = vor.u32 %v2572_v25, %v2388_v50  ;;  %v3296_v63 = vadd.f32 1e-05, %v509_v30  ;;  %1554 = vmatpush.bf16.msra.mxu0 %v2133_v7  ;;  %v3303_v8 = vpop.eup %2596  ;;  %v2568_v25 = vld [vmem:[%s4173_s2 + $0x38c] sm:$0xf] }
 0x1a8   :  { %v552_v47 = vmul.f32 0.5, %v551_v18  ;;  %v503_v1 = vmul.f32 %v467_v6, %v2824_v17  ;;  %v2137_v56 = vor.u32 %v2504_v53, %v2134_v42  ;;  %v604_v43 = vmul.f32 %v548_v38, %v2831_v21  ;;  %v2390_v38 = vld [vmem:[%s4173_s2 + $0x3a8] sm:$0xf0]  ;;  %v2356_v53 = vld [vmem:[%s4173_s2 + $0x348] sm:$0xf] }
 0x1a9   :  { %v532_v44 = vmul.f32 0.5, %v531_v27  ;;  %1568 = vmatpush.bf16.msra.mxu1 %v2389_v20  ;;  %v3301_v52 = vadd.f32 1e-05, %v508_v28  ;;  %v619_v18 = vmax.f32 %v603_v16, 0.0  ;;  %2598 = vrsqrt.f32 %v3296_v63  ;;  %v2100_v16 = vld [vmem:[%s4173_s2 + $0x148] sm:$0xf] }
 0x1aa   :  { %v553_v51 = vsub.f32 1.5, %v552_v47  ;;  %v3307_v50 = vadd.f32 1e-05, %v503_v1  ;;  %1582 = vmatpush.bf16.msra.mxu2 %v2137_v56  ;;  %v590_v21 = vmul.f32 %v3303_v8, %v3232_v32  ;;  %v2500_v27 = vld [vmem:[%s4173_s2 + $0x164] sm:$0xf0]  ;;  %v371_v29 = vrot.slane %v3259_v2, 4 }
 0x1ab   :  { %v533_v55 = vsub.f32 1.5, %v532_v44  ;;  %2600 = vrsqrt.f32 %v3301_v52  ;;  %vm536_vm12 = vweird.f32 %v3240_v49  ;;  %v2496_v4 = vld [vmem:[%s4173_s2 + $0x14c] sm:$0xf]  ;;  %v620_v7 = vmax.f32 %v604_v43, 0.0 }
 0x1ac   :  { %v554_v22 = vmul.f32 %v3221_v37, %v553_v51  ;;  %2602 = vrsqrt.f32 %v3307_v50  ;;  %v591_v30 = vmul.f32 %v3303_v8, %v590_v21  ;;  %v2102_v6 = vld [vmem:[%s4173_s2 + $0x168] sm:$0xf0]  ;;  %v3352_v20 = vsel %vm167_vm3, 0.0, %v367_v26  ;;  %vm537_vm14 = vmor %vm535_vm13, %vm536_vm12 }
 0x1ad   :  { %v534_v42 = vmul.f32 %v3240_v49, %v533_v55  ;;  %v2393_v44 = vor.u32 %v2568_v25, %v2390_v38  ;;  %v3355_v28 = vadd.f32 %v619_v18, %v3079_v31  ;;  %v3361_v51 = vsel %vm167_vm3, 0.0, %v321_v3  ;;  %v487_v31 = vpop.xlane.xlu0 %486 }
 0x1ae   :  { %v558_v47 = vsel %vm557_vm11, %v3221_v37, %v554_v22  ;;  %v2101_v37 = vor.u32 %v2500_v27, %v2100_v16  ;;  %v592_v1 = vmul.f32 0.5, %v591_v30  ;;  %v3369_v43 = vsel %vm167_vm3, 0.0, %v373_v24 }
 0x1af   :  { %v3363_v56 = vpop.eup %2598  ;;  %v605_v26 = vmul.f32 %v558_v47, %v2842_v5  ;;  %1596 = vmatpush.bf16.msra.mxu3 %v2393_v44  ;;  %v2357_v41 = vor.u32 %v2564_v45, %v2356_v53  ;;  %v2105_v55 = vor.u32 %v2496_v4, %v2102_v6  ;;  %v538_v3 = vsel %vm537_vm14, %v3240_v49, %v534_v42  ;;  %v2560_v4 = vld [vmem:[%s4173_s2 + $0x34c] sm:$0xf] }
 0x1b0   :  { %1555 = vmatpush.bf16.msra.mxu0 %v2101_v37  ;;  %v593_v22 = vsub.f32 1.5, %v592_v1  ;;  %vm596_vm15 = vweird.f32 %v3303_v8  ;;  %v580_v25 = vmul.f32 %v3363_v56, %v3296_v63  ;;  %v3380_v5 = vadd.f32 %v620_v7, %v3173_v54 }
 0x1b1   :  { %v3371_v18 = vpop.eup %2600  ;;  %v606_v38 = vmul.f32 %v558_v47, %v2845_v34  ;;  %v3386_v16 = vsel %vm167_vm3, 0.0, %v319_v12  ;;  %1569 = vmatpush.bf16.msra.mxu1 %v2357_v41  ;;  %1583 = vmatpush.bf16.msra.mxu2 %v2105_v55  ;;  %v507_v54 = vmul.f32 %v487_v31, %v2824_v17  ;;  %v601_v34 = vmul.f32 %v538_v3, %v2848_v35  ;;  %vm597_vm1 = vmor %vm595_vm0, %vm596_vm15  ;;  %v2068_v41 = vld [vmem:[%s4173_s2 + $0x108] sm:$0xf] }
 0x1b2   :  { %v3377_v21 = vpop.eup %2602  ;;  %v570_v49 = vmul.f32 %v3371_v18, %v3301_v52  ;;  %v594_v27 = vmul.f32 %v3303_v8, %v593_v22  ;;  %v581_v24 = vmul.f32 %v3363_v56, %v580_v25  ;;  %v621_v53 = vmax.f32 %v605_v26, 0.0  ;;  %v2492_v55 = vld [vmem:[%s4173_s2 + $0x124] sm:$0xf0] }
 0x1b3   :  { %v520_v42 = vmul.f32 %v3377_v21, %v3307_v50  ;;  %v647_v47 = vrot.slane %v3355_v28, 4  ;;  %v3403_v45 = vsel %vm167_vm3, 0.0, %v371_v29  ;;  %v687_v17 = vrot.slane %v3380_v5, 4  ;;  %v2358_v29 = vld [vmem:[%s4173_s2 + $0x368] sm:$0xf0] }
 0x1b4   :  { %v571_v12 = vmul.f32 %v3371_v18, %v570_v49  ;;  %v598_v30 = vsel %vm597_vm1, %v3303_v8, %v594_v27  ;;  %v582_v32 = vmul.f32 0.5, %v581_v24  ;;  %v622_v35 = vmax.f32 %v606_v38, 0.0  ;;  %v2556_v38 = vld [vmem:[%s4173_s2 + $0x324] sm:$0xf0]  ;;  %v2488_v49 = vld [vmem:[%s4173_s2 + $0x10c] sm:$0xf] }
 0x1b5   :  { %vm585_vm2 = vweird.f32 %v3296_v63  ;;  %vm575_vm4 = vweird.f32 %v3301_v52  ;;  %v521_v44 = vmul.f32 %v3377_v21, %v520_v42  ;;  %v3412_v8 = vadd.f32 1e-05, %v507_v54  ;;  %v2070_v27 = vld [vmem:[%s4173_s2 + $0x128] sm:$0xf0] }
 0x1b6   :  { %v583_v6 = vsub.f32 1.5, %v582_v32  ;;  %v572_v7 = vmul.f32 0.5, %v571_v12  ;;  %v602_v37 = vmul.f32 %v538_v3, %v2851_v36  ;;  %v617_v1 = vmax.f32 %v601_v34, 0.0  ;;  %v2324_v36 = vld [vmem:[%s4173_s2 + $0x308] sm:$0xf] }
 0x1b7   :  { %v3419_v26 = vadd.f32 %v621_v53, %v3185_v48  ;;  %v613_v31 = vmul.f32 %v598_v30, %v2868_v57  ;;  %vm576_vm5 = vweird.f32 %v3371_v18  ;;  %v522_v25 = vmul.f32 0.5, %v521_v44  ;;  %v2552_v34 = vld [vmem:[%s4173_s2 + $0x30c] sm:$0xf] }
 0x1b8   :  { %v573_v22 = vsub.f32 1.5, %v572_v7  ;;  %2604 = vrsqrt.f32 %v3412_v8  ;;  %v638_v57 = vadd.f32 %v622_v35, %v3293_v33  ;;  %v584_v48 = vmul.f32 %v3363_v56, %v583_v6  ;;  %v2326_v53 = vld [vmem:[%s4173_s2 + $0x328] sm:$0xf0]  ;;  %vm577_vm8 = vmor %vm575_vm4, %vm576_vm5  ;;  %v2036_v35 = vld [vmem:[%s4173_s2 + $0xc8] sm:$0xf] }
 0x1b9   :  { %vm586_vm6 = vweird.f32 %v3363_v56  ;;  %v2361_v3 = vor.u32 %v2560_v4, %v2358_v29  ;;  %v523_v33 = vsub.f32 1.5, %v522_v25  ;;  %vm526_vm7 = vweird.f32 %v3377_v21  ;;  %v2484_v4 = vld [vmem:[%s4173_s2 + $0xe4] sm:$0xf0]  ;;  %v2544_v25 = vld [vmem:[%s4173_s2 + $0x2cc] sm:$0xf] }
 0x1ba   :  { %v574_v24 = vmul.f32 %v3371_v18, %v573_v22  ;;  %v2069_v54 = vor.u32 %v2492_v55, %v2068_v41  ;;  %v618_v12 = vmax.f32 %v602_v37, 0.0  ;;  %v3454_v42 = vmul.f32 %v598_v30, %v2871_v58  ;;  %vm587_vm10 = vmor %vm585_vm2, %vm586_vm6  ;;  %v2038_v22 = vld [vmem:[%s4173_s2 + $0xe8] sm:$0xf0] }
 0x1bb   :  { %v629_v32 = vmax.f32 %v613_v31, 0.0  ;;  %vm525_vm9 = vweird.f32 %v3307_v50  ;;  %1597 = vmatpush.bf16.msra.mxu3 %v2361_v3  ;;  %v524_v52 = vmul.f32 %v3377_v21, %v523_v33  ;;  %v2325_v50 = vor.u32 %v2556_v38, %v2324_v36  ;;  %v2294_v36 = vld [vmem:[%s4173_s2 + $0x2e8] sm:$0xf0]  ;;  %v2260_v3 = vld [vmem:[%s4173_s2 + $0x288] sm:$0xf] }
 0x1bc   :  { %v578_v58 = vsel %vm577_vm8, %v3371_v18, %v574_v24  ;;  %1556 = vmatpush.bf16.msra.mxu0 %v2069_v54  ;;  %v2073_v30 = vor.u32 %v2488_v49, %v2070_v27  ;;  %v633_v6 = vadd.f32 %v617_v1, %v3330_v39  ;;  %v653_v7 = vrot.slane %v3419_v26, 4  ;;  %vm527_vm11 = vmor %vm525_vm9, %vm526_vm7  ;;  %v2292_v39 = vld [vmem:[%s4173_s2 + $0x2c8] sm:$0xf]  ;;  %v2472_v24 = vld [vmem:[%s4173_s2 + $0x8c] sm:$0xf] }
 0x1bd   :  { %v693_v44 = vrot.slane %v638_v57, 4  ;;  %v588_v29 = vsel %vm587_vm10, %v3363_v56, %v584_v48  ;;  %v528_v63 = vsel %vm527_vm11, %v3377_v21, %v524_v52  ;;  %1570 = vmatpush.bf16.msra.mxu1 %v2325_v50  ;;  %v2329_v18 = vor.u32 %v2552_v34, %v2326_v53  ;;  %v2548_v1 = vld [vmem:[%s4173_s2 + $0x2e4] sm:$0xf0]  ;;  %v2480_v56 = vld [vmem:[%s4173_s2 + $0xcc] sm:$0xf] }
 0x1be   :  { %v3478_v37 = vpop.eup %2604  ;;  %1584 = vmatpush.bf16.msra.mxu2 %v2073_v30  ;;  %v2037_v31 = vor.u32 %v2484_v4, %v2036_v35  ;;  %v634_v26 = vadd.f32 %v618_v12, %v3352_v20  ;;  %v3492_v21 = vadd.f32 %v629_v32, %v3361_v51  ;;  %v609_v41 = vmul.f32 %v578_v58, %v2874_v59  ;;  %v2004_v57 = vld [vmem:[%s4173_s2 + $0x88] sm:$0xf]  ;;  %v2006_v33 = vld [vmem:[%s4173_s2 + $0xa8] sm:$0xf0] }
 0x1bf   :  { %v610_v55 = vmul.f32 %v578_v58, %v2877_v61  ;;  %v630_v20 = vmax.f32 %v3454_v42, 0.0  ;;  %v599_v51 = vmul.f32 %v528_v63, %v2899_v11  ;;  %v600_v59 = vmul.f32 %v528_v63, %v2902_v13  ;;  %1598 = vmatpush.bf16.msra.mxu3 %v2329_v18  ;;  %v2476_v48 = vld [vmem:[%s4173_s2 + $0xa4] sm:$0xf0] }
 0x1c0   :  { %v560_v61 = vmul.f32 %v3478_v37, %v3412_v8  ;;  %1557 = vmatpush.bf16.msra.mxu0 %v2037_v31  ;;  %v3520_v11 = vsel %vm167_vm3, %v653_v7, %v633_v6  ;;  %v3523_v13 = vsel %vm167_vm3, %v693_v44, %v634_v26  ;;  %v611_v38 = vmul.f32 %v588_v29, %v2893_v9  ;;  %v2540_v27 = vld [vmem:[%s4173_s2 + $0x2a4] sm:$0xf0]  ;;  %v2536_v9 = vld [vmem:[%s4173_s2 + $0x28c] sm:$0xf] }
 0x1c1   :  { %v612_v49 = vmul.f32 %v588_v29, %v2896_v10  ;;  %v615_v54 = vmax.f32 %v599_v51, 0.0  ;;  %v616_v34 = vmax.f32 %v600_v59, 0.0  ;;  %v2293_v12 = vor.u32 %v2548_v1, %v2292_v39  ;;  %v2262_v10 = vld [vmem:[%s4173_s2 + $0x2a8] sm:$0xf0]  ;;  %v1972_v58 = vld [vmem:[%s4173_s2 + $0x48] sm:$0xf] }
 0x1c2   :  { %v561_v53 = vmul.f32 %v3478_v37, %v560_v61  ;;  %v625_v42 = vmax.f32 %v609_v41, 0.0  ;;  %v626_v32 = vmax.f32 %v610_v55, 0.0  ;;  %v2041_v35 = vor.u32 %v2480_v56, %v2038_v22  ;;  %v2468_v52 = vld [vmem:[%s4173_s2 + $0x64] sm:$0xf0]  ;;  %v2230_v41 = vld [vmem:[%s4173_s2 + $0x268] sm:$0xf0] }
 0x1c3   :  { %v2297_v4 = vor.u32 %v2544_v25, %v2294_v36  ;;  %v658_v50 = vperm.slane %v3520_v11, %v2712_v46  ;;  %v646_v30 = vadd.f32 %v630_v20, %v3369_v43  ;;  %v665_v6 = vrot.slane %v3492_v21, 4  ;;  %1571 = vmatpush.bf16.msra.mxu1 %v2293_v12  ;;  %v2228_v44 = vld [vmem:[%s4173_s2 + $0x248] sm:$0xf]  ;;  %v2464_v43 = vld [vmem:[%s4173_s2 + $0x4c] sm:$0xf] }
 0x1c4   :  { %v631_v7 = vadd.f32 %v615_v54, %v3102_v62  ;;  %v2532_v29 = vld [vmem:[%s4173_s2 + $0x264] sm:$0xf0]  ;;  %v562_v63 = vmul.f32 0.5, %v561_v53  ;;  %1585 = vmatpush.bf16.msra.mxu2 %v2041_v35  ;;  %v2005_v18 = vor.u32 %v2476_v48, %v2004_v57  ;;  %v2261_v31 = vor.u32 %v2540_v27, %v2260_v3  ;;  %v1974_v62 = vld [vmem:[%s4173_s2 + $0x68] sm:$0xf0] }
 0x1c5   :  { %1599 = vmatpush.bf16.msra.mxu3 %v2297_v4  ;;  %v2009_v39 = vor.u32 %v2472_v24, %v2006_v33  ;;  %v627_v1 = vmax.f32 %v611_v38, 0.0  ;;  %v628_v56 = vmax.f32 %v612_v49, 0.0  ;;  %v632_v26 = vadd.f32 %v616_v34, %v3224_v40  ;;  %v2528_v21 = vld [vmem:[%s4173_s2 + $0x24c] sm:$0xf]  ;;  %v1940_v40 = vld [vmem:[%s4173_s2 + $0x8] sm:$0xf] }
 0x1c6   :  { %vm566_vm12 = vweird.f32 %v3478_v37  ;;  %v641_v55 = vadd.f32 %v625_v42, %v3386_v16  ;;  %v642_v22 = vadd.f32 %v626_v32, %v3403_v45  ;;  %v563_v25 = vsub.f32 1.5, %v562_v63  ;;  %1558 = vmatpush.bf16.msra.mxu0 %v2005_v18  ;;  %v2460_v16 = vld [vmem:[%s4173_s2 + $0x24] sm:$0xf0]  ;;  %v2456_v3 = vld [vmem:[%s4173_s2 + $0xc] sm:$0xf] }
 0x1c7   :  { %v2265_v36 = vor.u32 %v2536_v9, %v2262_v10  ;;  %v705_v20 = vrot.slane %v646_v30, 4  ;;  %v648_v51 = vsel %vm167_vm3, %v647_v47, %v631_v7  ;;  %1572 = vmatpush.bf16.msra.mxu1 %v2261_v31  ;;  %v1973_v59 = vor.u32 %v2468_v52, %v1972_v58  ;;  %v2196_v45 = vld [vmem:[%s4173_s2 + $0x208] sm:$0xf]  ;;  %v1942_v38 = vld [vmem:[%s4173_s2 + $0x28] sm:$0xf0] }
 0x1c8   :  { %v2229_v61 = vor.u32 %v2532_v29, %v2228_v44  ;;  %v564_v57 = vmul.f32 %v3478_v37, %v563_v25  ;;  %vm565_vm13 = vweird.f32 %v3412_v8  ;;  %1586 = vmatpush.bf16.msra.mxu2 %v2009_v39  ;;  %v1977_v28 = vor.u32 %v2464_v43, %v1974_v62  ;;  %v2524_v47 = vld [vmem:[%s4173_s2 + $0x224] sm:$0xf0]  ;;  %v2520_v33 = vld [vmem:[%s4173_s2 + $0x20c] sm:$0xf]  ;;  %v2513_v25 = vld [vmem:[%s4173_s2 + $0x1d4] sm:$0xf] }
 0x1c9   :  { %1600 = vmatpush.bf16.msra.mxu3 %v2265_v36  ;;  %v2233_v48 = vor.u32 %v2528_v21, %v2230_v41  ;;  %v698_v49 = vperm.slane %v3523_v13, %v2712_v46  ;;  %v643_v8 = vadd.f32 %v627_v1, %v3168_v0  ;;  %v644_v27 = vadd.f32 %v628_v56, %v3271_v23  ;;  %vm567_vm14 = vmor %vm565_vm13, %vm566_vm12  ;;  %v2198_v54 = vld [vmem:[%s4173_s2 + $0x228] sm:$0xf0]  ;;  %v2172_v56 = vld [vmem:[%s4173_s2 + $0x1d0] sm:$0xf] }
 0x1ca   :  { %v688_v24 = vsel %vm167_vm3, %v687_v17, %v632_v26  ;;  %v666_v13 = vsel %vm167_vm3, %v665_v6, %v641_v55  ;;  %v706_v0 = vsel %vm167_vm3, %v705_v20, %v642_v22  ;;  %v568_v23 = vsel %vm567_vm14, %v3478_v37, %v564_v57  ;;  %1559 = vmatpush.bf16.msra.mxu0 %v1973_v59  ;;  %v2428_v26 = vld [vmem:[%s4173_s2 + $0x3d0] sm:$0xf]  ;;  %v2174_v36 = vld [vmem:[%s4173_s2 + $0x1f0] sm:$0xf0] }
 0x1cb   :  { %v1941_v5 = vor.u32 %v2460_v16, %v1940_v40  ;;  %v652_v17 = vperm.slane %v648_v51, %v2712_v46  ;;  %v607_v34 = vmul.f32 %v568_v23, %v2905_v14  ;;  %v608_v53 = vmul.f32 %v568_v23, %v2908_v15  ;;  %1573 = vmatpush.bf16.msra.mxu1 %v2229_v61  ;;  %v2581_v21 = vld [vmem:[%s4173_s2 + $0x3ec] sm:$0xf0]  ;;  %v2577_v40 = vld [vmem:[%s4173_s2 + $0x3d4] sm:$0xf] }
 0x1cc   :  { %v2197_v12 = vor.u32 %v2524_v47, %v2196_v45  ;;  %v692_v9 = vperm.slane %v688_v24, %v2712_v46  ;;  %1587 = vmatpush.bf16.msra.mxu2 %v1977_v28  ;;  %v1945_v10 = vor.u32 %v2456_v3, %v1942_v38  ;;  %v2201_v42 = vor.u32 %v2520_v33, %v2198_v54  ;;  %v2430_v20 = vld [vmem:[%s4173_s2 + $0x3f0] sm:$0xf0]  ;;  %v2140_v47 = vld [vmem:[%s4173_s2 + $0x190] sm:$0xf] }
 0x1cd   :  { %1601 = vmatpush.bf16.msra.mxu3 %v2233_v48  ;;  %v623_v32 = vmax.f32 %v607_v34, 0.0  ;;  %v624_v35 = vmax.f32 %v608_v53, 0.0  ;;  %v671_v37 = vrot.slane %v658_v50, 4  ;;  %v711_v4 = vrot.slane %v698_v49, 4  ;;  %v2509_v3 = vld [vmem:[%s4173_s2 + $0x1ac] sm:$0xf0] }
 0x1ce   :  { %v670_v58 = vperm.slane %v666_v13, %v2712_v46  ;;  %v710_v14 = vperm.slane %v706_v0, %v2712_v46  ;;  %1560 = vmatpush.bf16.msra.mxu0 %v1941_v5  ;;  %v659_v15 = vrot.slane %v643_v8, 4  ;;  %v699_v52 = vrot.slane %v644_v27, 4  ;;  %v2396_v8 = vld [vmem:[%s4173_s2 + $0x390] sm:$0xf]  ;;  %v2505_v24 = vld [vmem:[%s4173_s2 + $0x194] sm:$0xf] }
 0x1cf   :  { %v639_v30 = vadd.f32 %v623_v32, %v3243_v19  ;;  %v640_v6 = vadd.f32 %v624_v35, %v3259_v2  ;;  %1574 = vmatpush.bf16.msra.mxu1 %v2197_v12  ;;  %v672_v7 = vsel %vm167_vm3, %v671_v37, %v652_v17  ;;  %v712_v44 = vsel %vm167_vm3, %v711_v4, %v692_v9  ;;  %v2573_v27 = vld [vmem:[%s4173_s2 + $0x3ac] sm:$0xf0]  ;;  %v2142_v33 = vld [vmem:[%s4173_s2 + $0x1b0] sm:$0xf0] }
 0x1d0   :  { %1588 = vmatpush.bf16.msra.mxu2 %v1945_v10  ;;  %v677_v29 = vrot.slane %v670_v58, 4  ;;  %v717_v63 = vrot.slane %v710_v14, 4  ;;  %v676_v19 = vperm.slane %v672_v7, %v2718_v60  ;;  %v716_v2 = vperm.slane %v712_v44, %v2718_v60  ;;  %v2569_v54 = vld [vmem:[%s4173_s2 + $0x394] sm:$0xf]  ;;  %v2108_v5 = vld [vmem:[%s4173_s2 + $0x150] sm:$0xf] }
 0x1d1   :  { %1602 = vmatpush.bf16.msra.mxu3 %v2201_v42  ;;  %v660_v11 = vsel %vm167_vm3, %v659_v15, %v639_v30  ;;  %v700_v50 = vsel %vm167_vm3, %v699_v52, %v640_v6  ;;  %v2429_v48 = vor.u32 %v2581_v21, %v2428_v26  ;;  %v2177_v38 = vor.u32 %v2513_v25, %v2174_v36  ;;  %v2398_v13 = vld [vmem:[%s4173_s2 + $0x3b0] sm:$0xf0]  ;;  %v2501_v17 = vld [vmem:[%s4173_s2 + $0x16c] sm:$0xf0] }
 0x1d2   :  { %v664_v18 = vperm.slane %v660_v11, %v2712_v46  ;;  %v704_v31 = vperm.slane %v700_v50, %v2712_v46  ;;  %v2517_v46 = vld [vmem:[%s4173_s2 + $0x1ec] sm:$0xf0]  ;;  %v685_v41 = vrot.slane %v676_v19, 4  ;;  %v725_v55 = vrot.slane %v716_v2, 4  ;;  %v2497_v10 = vld [vmem:[%s4173_s2 + $0x154] sm:$0xf] }
 0x1d3   :  { %v2173_v28 = vor.u32 %v2517_v46, %v2172_v56  ;;  %v2433_v49 = vor.u32 %v2577_v40, %v2430_v20  ;;  %v2141_v0 = vor.u32 %v2509_v3, %v2140_v47  ;;  %v2397_v23 = vor.u32 %v2573_v27, %v2396_v8  ;;  %v2364_v12 = vld [vmem:[%s4173_s2 + $0x350] sm:$0xf]  ;;  %v2110_v42 = vld [vmem:[%s4173_s2 + $0x170] sm:$0xf0] }
 0x1d4   :  { %v678_v39 = vsel %vm167_vm3, %v677_v29, %v664_v18  ;;  %v718_v43 = vsel %vm167_vm3, %v717_v63, %v704_v31  ;;  %v2145_v34 = vor.u32 %v2505_v24, %v2142_v33  ;;  %v2401_v53 = vor.u32 %v2569_v54, %v2398_v13  ;;  %v2565_v9 = vld [vmem:[%s4173_s2 + $0x36c] sm:$0xf0]  ;;  %v2561_v32 = vld [vmem:[%s4173_s2 + $0x354] sm:$0xf] }
 0x1d5   :  { %v682_v62 = vperm.slane %v678_v39, %v2718_v60  ;;  %v722_v1 = vperm.slane %v718_v43, %v2718_v60  ;;  %v2366_v35 = vld [vmem:[%s4173_s2 + $0x370] sm:$0xf0]  ;;  %v2109_v37 = vor.u32 %v2501_v17, %v2108_v5  ;;  %v2365_v4 = vor.u32 %v2565_v9, %v2364_v12  ;;  %v2076_v58 = vld [vmem:[%s4173_s2 + $0x110] sm:$0xf] }
 0x1d6   :  { %v2493_v14 = vld [vmem:[%s4173_s2 + $0x12c] sm:$0xf0]  ;;  %v2113_v15 = vor.u32 %v2497_v10, %v2110_v42  ;;  %v2369_v52 = vor.u32 %v2561_v32, %v2366_v35  ;;  %v2489_v7 = vld [vmem:[%s4173_s2 + $0x114] sm:$0xf]  ;;  %v2180_v32 = vld [vmem:[%s4173_s2 + $0x1d8] sm:$0xf] }
 0x1d7   :  { %v683_v22 = vrot.slane %v682_v62, 4  ;;  %v723_v60 = vrot.slane %v722_v1, 4  ;;  %v686_v59 = vsel %vm167_vm3, %v682_v62, %v685_v41  ;;  %v726_v16 = vsel %vm167_vm3, %v722_v1, %v725_v55  ;;  %v2332_v30 = vld [vmem:[%s4173_s2 + $0x310] sm:$0xf]  ;;  %v2078_v44 = vld [vmem:[%s4173_s2 + $0x130] sm:$0xf0] }
 0x1d8   :  { %v2557_v6 = vld [vmem:[%s4173_s2 + $0x32c] sm:$0xf0]  ;;  %v2553_v11 = vld [vmem:[%s4173_s2 + $0x314] sm:$0xf]  ;;  %v2077_v29 = vor.u32 %v2493_v14, %v2076_v58  ;;  %v2518_v35 = vld [vmem:[%s4173_s2 + $0x1f4] sm:$0xf0] }
 0x1d9   :  { %v684_v51 = vsel %vm167_vm3, %v683_v22, %v676_v19  ;;  %v724_v61 = vsel %vm167_vm3, %v723_v60, %v716_v2  ;;  %v2334_v50 = vld [vmem:[%s4173_s2 + $0x330] sm:$0xf0]  ;;  %v2333_v63 = vor.u32 %v2557_v6, %v2332_v30  ;;  %v2044_v18 = vld [vmem:[%s4173_s2 + $0xd0] sm:$0xf]  ;;  %v2081_v19 = vor.u32 %v2489_v7, %v2078_v44  ;;  %v2514_v58 = vld [vmem:[%s4173_s2 + $0x1dc] sm:$0xf] }
 0x1da   :  { %v3668_v45 = vpack.c.bf16 %v686_v59, %v684_v51  ;;  %v3670_v57 = vpack.c.bf16 %v726_v16, %v724_v61  ;;  %v2485_v31 = vld [vmem:[%s4173_s2 + $0xec] sm:$0xf0]  ;;  %v2337_v2 = vor.u32 %v2553_v11, %v2334_v50  ;;  %v2481_v62 = vld [vmem:[%s4173_s2 + $0xd4] sm:$0xf]  ;;  %v2578_v30 = vld [vmem:[%s4173_s2 + $0x3dc] sm:$0xf]  ;;  %v2181_v11 = vor.u32 %v2518_v35, %v2180_v32 }
 0x1db   :  { %v2300_v39 = vld [vmem:[%s4173_s2 + $0x2d0] sm:$0xf]  ;;  %v2046_v1 = vld [vmem:[%s4173_s2 + $0xf0] sm:$0xf0]  ;;  %v2045_v26 = vor.u32 %v2485_v31, %v2044_v18  ;;  %v2438_v6 = vld [vmem:[%s4173_s2 + $0x3f8] sm:$0xf0] }
 0x1dc   :  { %1505 = vmatmul.bf16.vlgmr.msrb.gmra.mxu0 %v3668_v45  ;;  %1519 = vmatmul.bf16.vlgmr.msrb.gmra.mxu1 %v3670_v57  ;;  %v2549_v43 = vld [vmem:[%s4173_s2 + $0x2ec] sm:$0xf0]  ;;  %v2545_v56 = vld [vmem:[%s4173_s2 + $0x2d4] sm:$0xf]  ;;  %v2049_v22 = vor.u32 %v2481_v62, %v2046_v1  ;;  %v2441_v31 = vor.u32 %v2578_v30, %v2438_v6  ;;  %v2570_v62 = vld [vmem:[%s4173_s2 + $0x39c] sm:$0xf] }
 0x1dd   :  { %1533 = vmatmul.bf16.vlgmr.msrb.gmra.mxu2 %v3668_v45  ;;  %1547 = vmatmul.bf16.vlgmr.msrb.gmra.mxu3 %v3670_v57  ;;  %v2302_v46 = vld [vmem:[%s4173_s2 + $0x2f0] sm:$0xf0]  ;;  %v2301_v21 = vor.u32 %v2549_v43, %v2300_v39  ;;  %v2012_v41 = vld [vmem:[%s4173_s2 + $0x90] sm:$0xf]  ;;  %v2506_v39 = vld [vmem:[%s4173_s2 + $0x19c] sm:$0xf] }
 0x1de   :  { %1609 = vmatpush.bf16.msrb.mxu0 %v2173_v28  ;;  %1623 = vmatpush.bf16.msrb.mxu1 %v2429_v48  ;;  %v2477_v55 = vld [vmem:[%s4173_s2 + $0xac] sm:$0xf0]  ;;  %v2305_v60 = vor.u32 %v2545_v56, %v2302_v46  ;;  %v2473_v40 = vld [vmem:[%s4173_s2 + $0x94] sm:$0xf]  ;;  %v2150_v43 = vld [vmem:[%s4173_s2 + $0x1b8] sm:$0xf0] }
 0x1df   :  { %1637 = vmatpush.bf16.msrb.mxu2 %v2177_v38  ;;  %1651 = vmatpush.bf16.msrb.mxu3 %v2433_v49  ;;  %v2268_v25 = vld [vmem:[%s4173_s2 + $0x290] sm:$0xf]  ;;  %v2014_v20 = vld [vmem:[%s4173_s2 + $0xb0] sm:$0xf0]  ;;  %v2013_v61 = vor.u32 %v2477_v55, %v2012_v41  ;;  %v2406_v1 = vld [vmem:[%s4173_s2 + $0x3b8] sm:$0xf0]  ;;  %v2153_v41 = vor.u32 %v2506_v39, %v2150_v43 }
 0x1e0   :  { %v2541_v36 = vld [vmem:[%s4173_s2 + $0x2ac] sm:$0xf0]  ;;  %v2537_v51 = vld [vmem:[%s4173_s2 + $0x294] sm:$0xf]  ;;  %v2017_v47 = vor.u32 %v2473_v40, %v2014_v20  ;;  %v2409_v55 = vor.u32 %v2570_v62, %v2406_v1  ;;  %v2562_v40 = vld [vmem:[%s4173_s2 + $0x35c] sm:$0xf] }
 0x1e1   :  { %v2270_v59 = vld [vmem:[%s4173_s2 + $0x2b0] sm:$0xf0]  ;;  %v2269_v16 = vor.u32 %v2541_v36, %v2268_v25  ;;  %v1980_v28 = vld [vmem:[%s4173_s2 + $0x50] sm:$0xf]  ;;  %v2498_v25 = vld [vmem:[%s4173_s2 + $0x15c] sm:$0xf] }
 0x1e2   :  { %1610 = vmatpush.bf16.msrb.mxu0 %v2141_v0  ;;  %1624 = vmatpush.bf16.msrb.mxu1 %v2397_v23  ;;  %v2469_v48 = vld [vmem:[%s4173_s2 + $0x6c] sm:$0xf0]  ;;  %v2273_v3 = vor.u32 %v2537_v51, %v2270_v59  ;;  %v2465_v8 = vld [vmem:[%s4173_s2 + $0x54] sm:$0xf]  ;;  %v2118_v36 = vld [vmem:[%s4173_s2 + $0x178] sm:$0xf0] }
 0x1e3   :  { %1638 = vmatpush.bf16.msrb.mxu2 %v2145_v34  ;;  %1652 = vmatpush.bf16.msrb.mxu3 %v2401_v53  ;;  %v2236_v38 = vld [vmem:[%s4173_s2 + $0x250] sm:$0xf]  ;;  %v1982_v27 = vld [vmem:[%s4173_s2 + $0x70] sm:$0xf0]  ;;  %v1981_v13 = vor.u32 %v2469_v48, %v1980_v28  ;;  %v2374_v20 = vld [vmem:[%s4173_s2 + $0x378] sm:$0xf0]  ;;  %v2121_v28 = vor.u32 %v2498_v25, %v2118_v36 }
 0x1e4   :  { %v2533_v49 = vld [vmem:[%s4173_s2 + $0x26c] sm:$0xf0]  ;;  %v2529_v24 = vld [vmem:[%s4173_s2 + $0x254] sm:$0xf]  ;;  %v1985_v34 = vor.u32 %v2465_v8, %v1982_v27  ;;  %v2377_v48 = vor.u32 %v2562_v40, %v2374_v20  ;;  %v2554_v8 = vld [vmem:[%s4173_s2 + $0x31c] sm:$0xf] }
 0x1e5   :  { %v2238_v33 = vld [vmem:[%s4173_s2 + $0x270] sm:$0xf0]  ;;  %v1948_v54 = vld [vmem:[%s4173_s2 + $0x10] sm:$0xf]  ;;  %v2237_v0 = vor.u32 %v2533_v49, %v2236_v38  ;;  %v2490_v38 = vld [vmem:[%s4173_s2 + $0x11c] sm:$0xf] }
 0x1e6   :  { %1611 = vmatpush.bf16.msrb.mxu0 %v2109_v37  ;;  %1625 = vmatpush.bf16.msrb.mxu1 %v2365_v4  ;;  %v2461_v23 = vld [vmem:[%s4173_s2 + $0x2c] sm:$0xf0]  ;;  %v2241_v53 = vor.u32 %v2529_v24, %v2238_v33  ;;  %v2457_v12 = vld [vmem:[%s4173_s2 + $0x14] sm:$0xf]  ;;  %v2436_v37 = vld [vmem:[%s4173_s2 + $0x3d8] sm:$0xf] }
 0x1e7   :  { %1639 = vmatpush.bf16.msrb.mxu2 %v2113_v15  ;;  %1653 = vmatpush.bf16.msrb.mxu3 %v2369_v52  ;;  %v2204_v5 = vld [vmem:[%s4173_s2 + $0x210] sm:$0xf]  ;;  %v1950_v9 = vld [vmem:[%s4173_s2 + $0x30] sm:$0xf0]  ;;  %v2582_v4 = vld [vmem:[%s4173_s2 + $0x3f4] sm:$0xf0]  ;;  %v1949_v14 = vor.u32 %v2461_v23, %v1948_v54 }
 0x1e8   :  { %v2525_v17 = vld [vmem:[%s4173_s2 + $0x22c] sm:$0xf0]  ;;  %v2521_v10 = vld [vmem:[%s4173_s2 + $0x214] sm:$0xf]  ;;  %v2182_v52 = vld [vmem:[%s4173_s2 + $0x1f8] sm:$0xf0]  ;;  %v1953_v7 = vor.u32 %v2457_v12, %v1950_v9  ;;  %v2437_v50 = vor.u32 %v2582_v4, %v2436_v37 }
 0x1e9   :  { %v2206_v42 = vld [vmem:[%s4173_s2 + $0x230] sm:$0xf0]  ;;  %v2205_v15 = vor.u32 %v2525_v17, %v2204_v5  ;;  %v2185_v18 = vor.u32 %v2514_v58, %v2182_v52  ;;  %v2086_v49 = vld [vmem:[%s4173_s2 + $0x138] sm:$0xf0]  ;;  %v2052_v54 = vld [vmem:[%s4173_s2 + $0xd8] sm:$0xf] }
 0x1ea   :  { %1612 = vmatpush.bf16.msrb.mxu0 %v2077_v29  ;;  %1626 = vmatpush.bf16.msrb.mxu1 %v2333_v63  ;;  %v2209_v44 = vor.u32 %v2521_v10, %v2206_v42  ;;  %v2148_v29 = vld [vmem:[%s4173_s2 + $0x198] sm:$0xf]  ;;  %v2342_v27 = vld [vmem:[%s4173_s2 + $0x338] sm:$0xf0] }
 0x1eb   :  { %1640 = vmatpush.bf16.msrb.mxu2 %v2081_v19  ;;  %1654 = vmatpush.bf16.msrb.mxu3 %v2337_v2  ;;  %v2510_v63 = vld [vmem:[%s4173_s2 + $0x1b4] sm:$0xf0]  ;;  %v2345_v23 = vor.u32 %v2554_v8, %v2342_v27  ;;  %v2546_v12 = vld [vmem:[%s4173_s2 + $0x2dc] sm:$0xf] }
 0x1ec   :  { %1561 = vmatmul.bf16.vlgmr.msra.gmra.mxu0 %v3668_v45  ;;  %1575 = vmatmul.bf16.vlgmr.msra.gmra.mxu1 %v3670_v57  ;;  %v2404_v19 = vld [vmem:[%s4173_s2 + $0x398] sm:$0xf]  ;;  %v2149_v56 = vor.u32 %v2510_v63, %v2148_v29  ;;  %v2310_v9 = vld [vmem:[%s4173_s2 + $0x2f8] sm:$0xf0] }
 0x1ed   :  { %1589 = vmatmul.bf16.vlgmr.msra.gmra.mxu2 %v3668_v45  ;;  %1603 = vmatmul.bf16.vlgmr.msra.gmra.mxu3 %v3670_v57  ;;  %v2574_v2 = vld [vmem:[%s4173_s2 + $0x3b4] sm:$0xf0]  ;;  %v2313_v4 = vor.u32 %v2546_v12, %v2310_v9  ;;  %v2022_v52 = vld [vmem:[%s4173_s2 + $0xb8] sm:$0xf0] }
 0x1ee   :  { %1613 = vmatpush.bf16.msrb.mxu0 %v2045_v26  ;;  %1627 = vmatpush.bf16.msrb.mxu1 %v2301_v21  ;;  %v2405_v46 = vor.u32 %v2574_v2, %v2404_v19  ;;  %v2116_v26 = vld [vmem:[%s4173_s2 + $0x158] sm:$0xf]  ;;  %v2538_v30 = vld [vmem:[%s4173_s2 + $0x29c] sm:$0xf] }
 0x1ef   :  { %1641 = vmatpush.bf16.msrb.mxu2 %v2049_v22  ;;  %1655 = vmatpush.bf16.msrb.mxu3 %v2305_v60  ;;  %v2502_v21 = vld [vmem:[%s4173_s2 + $0x174] sm:$0xf0]  ;;  %v2278_v6 = vld [vmem:[%s4173_s2 + $0x2b8] sm:$0xf0] }
 0x1f0   :  { %v2372_v22 = vld [vmem:[%s4173_s2 + $0x358] sm:$0xf]  ;;  %v2117_v51 = vor.u32 %v2502_v21, %v2116_v26  ;;  %v2281_v63 = vor.u32 %v2538_v30, %v2278_v6  ;;  %v2466_v19 = vld [vmem:[%s4173_s2 + $0x5c] sm:$0xf] }
 0x1f1   :  { %v2566_v60 = vld [vmem:[%s4173_s2 + $0x374] sm:$0xf0]  ;;  %v1990_v2 = vld [vmem:[%s4173_s2 + $0x78] sm:$0xf0] }
 0x1f2   :  { %1614 = vmatpush.bf16.msrb.mxu0 %v2013_v61  ;;  %1628 = vmatpush.bf16.msrb.mxu1 %v2269_v16  ;;  %v2373_v59 = vor.u32 %v2566_v60, %v2372_v22  ;;  %v2084_v61 = vld [vmem:[%s4173_s2 + $0x118] sm:$0xf]  ;;  %v2530_v39 = vld [vmem:[%s4173_s2 + $0x25c] sm:$0xf]  ;;  %v1993_v26 = vor.u32 %v2466_v19, %v1990_v2 }
 0x1f3   :  { %1642 = vmatpush.bf16.msrb.mxu2 %v2017_v47  ;;  %1656 = vmatpush.bf16.msrb.mxu3 %v2273_v3  ;;  %v2494_v16 = vld [vmem:[%s4173_s2 + $0x134] sm:$0xf0]  ;;  %v2246_v43 = vld [vmem:[%s4173_s2 + $0x278] sm:$0xf0] }
 0x1f4   :  { %v2340_v47 = vld [vmem:[%s4173_s2 + $0x318] sm:$0xf]  ;;  %v2085_v24 = vor.u32 %v2494_v16, %v2084_v61  ;;  %v2249_v21 = vor.u32 %v2530_v39, %v2246_v43  ;;  %v2458_v22 = vld [vmem:[%s4173_s2 + $0x1c] sm:$0xf] }
 0x1f5   :  { %v2558_v3 = vld [vmem:[%s4173_s2 + $0x334] sm:$0xf0]  ;;  %v1958_v60 = vld [vmem:[%s4173_s2 + $0x38] sm:$0xf0] }
 0x1f6   :  { %1615 = vmatpush.bf16.msrb.mxu0 %v1981_v13  ;;  %1629 = vmatpush.bf16.msrb.mxu1 %v2237_v0  ;;  %v2341_v33 = vor.u32 %v2558_v3, %v2340_v47  ;;  %v2486_v13 = vld [vmem:[%s4173_s2 + $0xf4] sm:$0xf0]  ;;  %v2089_v0 = vor.u32 %v2490_v38, %v2086_v49  ;;  %v2522_v25 = vld [vmem:[%s4173_s2 + $0x21c] sm:$0xf] }
 0x1f7   :  { %1643 = vmatpush.bf16.msrb.mxu2 %v1985_v34  ;;  %1657 = vmatpush.bf16.msrb.mxu3 %v2241_v53  ;;  %v2308_v5 = vld [vmem:[%s4173_s2 + $0x2d8] sm:$0xf]  ;;  %v2482_v34 = vld [vmem:[%s4173_s2 + $0xdc] sm:$0xf]  ;;  %v2053_v10 = vor.u32 %v2486_v13, %v2052_v54 }
 0x1f8   :  { %v2550_v17 = vld [vmem:[%s4173_s2 + $0x2f4] sm:$0xf0]  ;;  %v2054_v53 = vld [vmem:[%s4173_s2 + $0xf8] sm:$0xf0] }
 0x1f9   :  { %v2309_v42 = vor.u32 %v2550_v17, %v2308_v5  ;;  %v2020_v32 = vld [vmem:[%s4173_s2 + $0x98] sm:$0xf]  ;;  %v2057_v37 = vor.u32 %v2482_v34, %v2054_v53  ;;  %v2214_v36 = vld [vmem:[%s4173_s2 + $0x238] sm:$0xf0] }
 0x1fa   :  { %1616 = vmatpush.bf16.msrb.mxu0 %v1949_v14  ;;  %1630 = vmatpush.bf16.msrb.mxu1 %v2205_v15  ;;  %v2478_v35 = vld [vmem:[%s4173_s2 + $0xb4] sm:$0xf0]  ;;  %v2474_v15 = vld [vmem:[%s4173_s2 + $0x9c] sm:$0xf] }
 0x1fb   :  { %1644 = vmatpush.bf16.msrb.mxu2 %v1953_v7  ;;  %1658 = vmatpush.bf16.msrb.mxu3 %v2209_v44  ;;  %v2276_v58 = vld [vmem:[%s4173_s2 + $0x298] sm:$0xf]  ;;  %v2021_v7 = vor.u32 %v2478_v35, %v2020_v32  ;;  %v2025_v29 = vor.u32 %v2474_v15, %v2022_v52 }
 0x1fc   :  { %v2542_v14 = vld [vmem:[%s4173_s2 + $0x2b4] sm:$0xf0] }
 0x1fd   :  { %1617 = vmatmul.bf16.vlgmr.msrb.gmra.mxu0 %v3668_v45  ;;  %1631 = vmatmul.bf16.vlgmr.msrb.gmra.mxu1 %v3670_v57  ;;  %v2277_v44 = vor.u32 %v2542_v14, %v2276_v58 }
 0x1fe   :  { %1665 = vmatpush.bf16.msra.mxu0 %v2181_v11  ;;  %1679 = vmatpush.bf16.msra.mxu1 %v2437_v50  ;;  %v1988_v11 = vld [vmem:[%s4173_s2 + $0x58] sm:$0xf] }
 0x1ff   :  { %1693 = vmatpush.bf16.msra.mxu2 %v2185_v18  ;;  %1707 = vmatpush.bf16.msra.mxu3 %v2441_v31  ;;  %v2470_v50 = vld [vmem:[%s4173_s2 + $0x74] sm:$0xf0] }
 0x200   :  { %1645 = vmatmul.bf16.vlgmr.msrb.gmra.mxu2 %v3668_v45  ;;  %1659 = vmatmul.bf16.vlgmr.msrb.gmra.mxu3 %v3670_v57  ;;  %v2244_v18 = vld [vmem:[%s4173_s2 + $0x258] sm:$0xf]  ;;  %v1989_v62 = vor.u32 %v2470_v50, %v1988_v11 }
 0x201   :  { %v2534_v31 = vld [vmem:[%s4173_s2 + $0x274] sm:$0xf0] }
 0x202   :  { %1666 = vmatpush.bf16.msra.mxu0 %v2149_v56  ;;  %1680 = vmatpush.bf16.msra.mxu1 %v2405_v46  ;;  %v2245_v1 = vor.u32 %v2534_v31, %v2244_v18  ;;  %v1956_v56 = vld [vmem:[%s4173_s2 + $0x18] sm:$0xf] }
 0x203   :  { %1694 = vmatpush.bf16.msra.mxu2 %v2153_v41  ;;  %1708 = vmatpush.bf16.msra.mxu3 %v2409_v55  ;;  %v2462_v46 = vld [vmem:[%s4173_s2 + $0x34] sm:$0xf0] }
 0x204   :  { %v2212_v41 = vld [vmem:[%s4173_s2 + $0x218] sm:$0xf]  ;;  %v1957_v40 = vor.u32 %v2462_v46, %v1956_v56 }
 0x205   :  { %v2526_v55 = vld [vmem:[%s4173_s2 + $0x234] sm:$0xf0] }
 0x206   :  { %1667 = vmatpush.bf16.msra.mxu0 %v2117_v51  ;;  %1681 = vmatpush.bf16.msra.mxu1 %v2373_v59  ;;  %v2213_v20 = vor.u32 %v2526_v55, %v2212_v41  ;;  %v1961_v51 = vor.u32 %v2458_v22, %v1958_v60  ;;  %v2217_v59 = vor.u32 %v2522_v25, %v2214_v36 }
 0x207   :  { %1695 = vmatpush.bf16.msra.mxu2 %v2121_v28  ;;  %1709 = vmatpush.bf16.msra.mxu3 %v2377_v48 }
 0x20a   :  { %1668 = vmatpush.bf16.msra.mxu0 %v2085_v24  ;;  %1682 = vmatpush.bf16.msra.mxu1 %v2341_v33 }
 0x20b   :  { %1696 = vmatpush.bf16.msra.mxu2 %v2089_v0  ;;  %1710 = vmatpush.bf16.msra.mxu3 %v2345_v23 }
 0x20e   :  { %1669 = vmatpush.bf16.msra.mxu0 %v2053_v10  ;;  %1683 = vmatpush.bf16.msra.mxu1 %v2309_v42 }
 0x20f   :  { %1697 = vmatpush.bf16.msra.mxu2 %v2057_v37  ;;  %1711 = vmatpush.bf16.msra.mxu3 %v2313_v4 }
 0x212   :  { %1670 = vmatpush.bf16.msra.mxu0 %v2021_v7  ;;  %1684 = vmatpush.bf16.msra.mxu1 %v2277_v44 }
 0x213   :  { %1698 = vmatpush.bf16.msra.mxu2 %v2025_v29  ;;  %1712 = vmatpush.bf16.msra.mxu3 %v2281_v63 }
 0x216   :  { %1671 = vmatpush.bf16.msra.mxu0 %v1989_v62  ;;  %1685 = vmatpush.bf16.msra.mxu1 %v2245_v1 }
 0x217   :  { %1699 = vmatpush.bf16.msra.mxu2 %v1993_v26  ;;  %1713 = vmatpush.bf16.msra.mxu3 %v2249_v21 }
 0x21a   :  { %1672 = vmatpush.bf16.msra.mxu0 %v1957_v40  ;;  %1686 = vmatpush.bf16.msra.mxu1 %v2213_v20 }
 0x21b   :  { %1700 = vmatpush.bf16.msra.mxu2 %v1961_v51  ;;  %1714 = vmatpush.bf16.msra.mxu3 %v2217_v59  ;;  %v2616_v51 = vmov 1024.0  }
 0x21c   :  { %2606 = vrcp.f32 %v2616_v51 }
 0x21d   :  { %1673 = vmatmul.bf16.vlgmr.msra.gmra.mxu0 %v3668_v45  ;;  %1687 = vmatmul.bf16.vlgmr.msra.gmra.mxu1 %v3670_v57 }
 0x21e   :  { %1701 = vmatmul.bf16.vlgmr.msra.gmra.mxu2 %v3668_v45  ;;  %1715 = vmatmul.bf16.vlgmr.msra.gmra.mxu3 %v3670_v57 }
 0x222   :  { %v2607_v59 = vpop.eup %2606 }
 0x223   :  { %vm1744_vm3 = vweird.f32 %v2607_v59 }
 0x259   :  { %v1506_v61 = vpop.f32.mrf.mxu0  ;;  %v1520_v16 = vpop.f32.mrf.mxu1 }
 0x25a   :  { %v1521_v9 = vadd.f32 %v1520_v16, %v1506_v61  ;;  %v1740_v61 = vmul.f32 1024.0, %v2607_v59 }
 0x25c   :  { %v1741_v16 = vsub.f32 1.0, %v1740_v61 }
 0x260   :  { %v1534_v28 = vpop.f32.mrf.mxu2  ;;  %v1548_v48 = vpop.f32.mrf.mxu3 }
 0x261   :  { %v1508_v47 = vpop.f32.mrf.mxu0  ;;  %v1522_v3 = vpop.f32.mrf.mxu1  ;;  %v1549_v12 = vadd.f32 %v1548_v48, %v1534_v28  ;;  %v1742_v28 = vmul.f32 %v2607_v59, %v1741_v16 }
 0x262   :  { %v1523_v7 = vadd.f32 %v1522_v3, %v1508_v47 }
 0x263   :  { %v1721_v42 = vadd.f32 %v1549_v12, %v1521_v9  ;;  %v1743_v48 = vadd.f32 %v2607_v59, %v1742_v28 }
 0x265   :  { %v1745_v47 = vsel %vm1744_vm3, %v2607_v59, %v1743_v48 }
 0x268   :  { %v1536_v38 = vpop.f32.mrf.mxu2  ;;  %v1550_v49 = vpop.f32.mrf.mxu3 }
 0x269   :  { %v1562_v8 = vpop.f32.mrf.mxu0  ;;  %v1576_v27 = vpop.f32.mrf.mxu1  ;;  %v1551_v52 = vadd.f32 %v1550_v49, %v1536_v38 }
 0x26a   :  { %v1577_v10 = vadd.f32 %v1576_v27, %v1562_v8 }
 0x26b   :  { %v1730_v29 = vadd.f32 %v1551_v52, %v1523_v7 }
 0x26c   :  { %v1722_v4 = vadd.f32 %v1721_v42, %v1577_v10 }
 0x270   :  { %v1590_v24 = vpop.f32.mrf.mxu2  ;;  %v1604_v33 = vpop.f32.mrf.mxu3 }
 0x271   :  { %v1564_v54 = vpop.f32.mrf.mxu0  ;;  %v1578_v13 = vpop.f32.mrf.mxu1  ;;  %v1605_v32 = vadd.f32 %v1604_v33, %v1590_v24 }
 0x272   :  { %v1579_v44 = vadd.f32 %v1578_v13, %v1564_v54 }
 0x273   :  { %v1723_v30 = vadd.f32 %v1722_v4, %v1605_v32 }
 0x274   :  { %v1731_v2 = vadd.f32 %v1730_v29, %v1579_v44 }
 0x278   :  { %v1592_v0 = vpop.f32.mrf.mxu2  ;;  %v1606_v23 = vpop.f32.mrf.mxu3 }
 0x279   :  { %v1607_v63 = vadd.f32 %v1606_v23, %v1592_v0 }
 0x27a   :  { %v1618_v5 = vpop.f32.mrf.mxu0  ;;  %v1632_v45 = vpop.f32.mrf.mxu1 }
 0x27b   :  { %v1633_v58 = vadd.f32 %v1632_v45, %v1618_v5  ;;  %v1732_v46 = vadd.f32 %v1731_v2, %v1607_v63 }
 0x27d   :  { %v1724_v11 = vadd.f32 %v1723_v30, %v1633_v58 }
 0x282   :  { %v1620_v34 = vpop.f32.mrf.mxu0  ;;  %v1634_v53 = vpop.f32.mrf.mxu1 }
 0x283   :  { %v1646_v17 = vpop.f32.mrf.mxu2  ;;  %v1660_v57 = vpop.f32.mrf.mxu3  ;;  %v1635_v39 = vadd.f32 %v1634_v53, %v1620_v34 }
 0x284   :  { %v1661_v6 = vadd.f32 %v1660_v57, %v1646_v17 }
 0x285   :  { %v1733_v41 = vadd.f32 %v1732_v46, %v1635_v39 }
 0x286   :  { %v1725_v18 = vadd.f32 %v1724_v11, %v1661_v6 }
 0x28b   :  { %v1648_v35 = vpop.f32.mrf.mxu2  ;;  %v1662_v37 = vpop.f32.mrf.mxu3 }
 0x28c   :  { %v1663_v26 = vadd.f32 %v1662_v37, %v1648_v35 }
 0x28e   :  { %v1734_v22 = vadd.f32 %v1733_v41, %v1663_v26 }
 0x29a   :  { %v1674_v14 = vpop.f32.mrf.mxu0  ;;  %v1688_v15 = vpop.f32.mrf.mxu1 }
 0x29b   :  { %v1689_v50 = vadd.f32 %v1688_v15, %v1674_v14 }
 0x29d   :  { %v1726_v43 = vadd.f32 %v1725_v18, %v1689_v50 }
 0x2a1   :  { %v1702_v31 = vpop.f32.mrf.mxu2  ;;  %v1716_v19 = vpop.f32.mrf.mxu3 }
 0x2a2   :  { %v1717_v62 = vadd.f32 %v1716_v19, %v1702_v31  ;;  %v1676_v1 = vpop.f32.mrf.mxu0  ;;  %v1690_v56 = vpop.f32.mrf.mxu1 }
 0x2a3   :  { %v1691_v55 = vadd.f32 %v1690_v56, %v1676_v1 }
 0x2a4   :  { %v1727_v21 = vadd.f32 %v1726_v43, %v1717_v62 }
 0x2a5   :  { %v1735_v36 = vadd.f32 %v1734_v22, %v1691_v55 }
 0x2a6   :  { %1728 = vadd.xlane.f32.xlu1 %v1727_v21 }
 0x2a9   :  { %v1704_v60 = vpop.f32.mrf.mxu2  ;;  %v1718_v25 = vpop.f32.mrf.mxu3 }
 0x2aa   :  { %v1719_v40 = vadd.f32 %v1718_v25, %v1704_v60 }
 0x2ac   :  { %v1736_v20 = vadd.f32 %v1735_v36, %v1719_v40 }
 0x2ae   :  { %1737 = vadd.xlane.f32.xlu2 %v1736_v20 }
 0x319   :  { %v1729_v3 = vpop.xlane.xlu1 %1728 }
 0x31a   :  { %v1746_v38 = vmul.f32 %v1745_v47, %v1729_v3 }
 0x31c   :  { %v4048_v49 = vsub.f32 %v1521_v9, %v1746_v38  ;;  %v4050_v8 = vsub.f32 %v1549_v12, %v1746_v38  ;;  %v4052_v27 = vsub.f32 %v1577_v10, %v1746_v38  ;;  %v4054_v24 = vsub.f32 %v1605_v32, %v1746_v38 }
 0x31d   :  { %v4060_v13 = vsub.f32 %v1633_v58, %v1746_v38  ;;  %v4064_v45 = vsub.f32 %v1661_v6, %v1746_v38  ;;  %v4068_v53 = vsub.f32 %v1689_v50, %v1746_v38  ;;  %v1755_v35 = vsub.f32 %v1717_v62, %v1746_v38 }
 0x31e   :  { %v1764_v33 = vmul.f32 %v4048_v49, %v4048_v49  ;;  %v1765_v54 = vmul.f32 %v4050_v8, %v4050_v8  ;;  %v1766_v0 = vmul.f32 %v4052_v27, %v4052_v27  ;;  %v1767_v57 = vmul.f32 %v4054_v24, %v4054_v24 }
 0x31f   :  { %v1768_v12 = vmul.f32 %v4060_v13, %v4060_v13  ;;  %v1769_v37 = vmul.f32 %v4064_v45, %v4064_v45  ;;  %v1770_v30 = vmul.f32 %v4068_v53, %v4068_v53  ;;  %v1771_v11 = vmul.f32 %v1755_v35, %v1755_v35 }
 0x320   :  { %v1780_v23 = vadd.f32 %v1765_v54, %v1764_v33 }
 0x321   :  { %v1738_v5 = vpop.xlane.xlu2 %1737 }
 0x322   :  { %v1747_v17 = vmul.f32 %v1745_v47, %v1738_v5  ;;  %v1781_v34 = vadd.f32 %v1780_v23, %v1766_v0 }
 0x324   :  { %v1782_v9 = vadd.f32 %v1781_v34, %v1767_v57  ;;  %v4072_v10 = vsub.f32 %v1523_v7, %v1747_v17  ;;  %v4074_v42 = vsub.f32 %v1551_v52, %v1747_v17  ;;  %v4076_v32 = vsub.f32 %v1579_v44, %v1747_v17 }
 0x325   :  { %v4080_v58 = vsub.f32 %v1607_v63, %v1747_v17  ;;  %v4088_v6 = vsub.f32 %v1635_v39, %v1747_v17  ;;  %v4092_v29 = vsub.f32 %v1663_v26, %v1747_v17  ;;  %v4096_v19 = vsub.f32 %v1691_v55, %v1747_v17 }
 0x326   :  { %v1783_v4 = vadd.f32 %v1782_v9, %v1768_v12  ;;  %v1772_v14 = vmul.f32 %v4072_v10, %v4072_v10  ;;  %v1773_v15 = vmul.f32 %v4074_v42, %v4074_v42  ;;  %v1774_v7 = vmul.f32 %v4076_v32, %v4076_v32 }
 0x327   :  { %v1775_v63 = vmul.f32 %v4080_v58, %v4080_v58  ;;  %v1776_v2 = vmul.f32 %v4088_v6, %v4088_v6  ;;  %v4100_v43 = vsub.f32 %v1719_v40, %v1747_v17  ;;  %v1777_v62 = vmul.f32 %v4092_v29, %v4092_v29 }
 0x328   :  { %v1784_v52 = vadd.f32 %v1783_v4, %v1769_v37  ;;  %v1789_v44 = vadd.f32 %v1773_v15, %v1772_v14  ;;  %v1778_v56 = vmul.f32 %v4096_v19, %v4096_v19 }
 0x329   :  { %v1779_v26 = vmul.f32 %v4100_v43, %v4100_v43 }
 0x32a   :  { %v1785_v50 = vadd.f32 %v1784_v52, %v1770_v30  ;;  %v1790_v18 = vadd.f32 %v1789_v44, %v1774_v7 }
 0x32c   :  { %v1786_v31 = vadd.f32 %v1785_v50, %v1771_v11  ;;  %v1791_v39 = vadd.f32 %v1790_v18, %v1775_v63 }
 0x32e   :  { %1787 = vadd.xlane.f32.xlu0 %v1786_v31  ;;  %v1792_v1 = vadd.f32 %v1791_v39, %v1776_v2 }
 0x330   :  { %v1793_v46 = vadd.f32 %v1792_v1, %v1777_v62 }
 0x332   :  { %v1794_v21 = vadd.f32 %v1793_v46, %v1778_v56 }
 0x334   :  { %v1795_v41 = vadd.f32 %v1794_v21, %v1779_v26 }
 0x336   :  { %1796 = vadd.xlane.f32.xlu1 %v1795_v41 }
 0x3a1   :  { %v1788_v55 = vpop.xlane.xlu0 %1787 }
 0x3a2   :  { %v1798_v22 = vmul.f32 %v1788_v55, %v1745_v47 }
 0x3a4   :  { %v1800_v60 = vadd.f32 1e-05, %v1798_v22 }
 0x3a6   :  { %2608 = vrsqrt.f32 %v1800_v60  ;;  %vm1808_vm0 = vweird.f32 %v1800_v60 }
 0x3a9   :  { %v1797_v25 = vpop.xlane.xlu1 %1796 }
 0x3aa   :  { %v1799_v36 = vmul.f32 %v1797_v25, %v1745_v47 }
 0x3ac   :  { %v2609_v40 = vpop.eup %2608  ;;  %v1801_v20 = vadd.f32 1e-05, %v1799_v36 }
 0x3ad   :  { %v1803_v51 = vmul.f32 %v2609_v40, %v1800_v60  ;;  %vm1809_vm15 = vweird.f32 %v2609_v40 }
 0x3ae   :  { %2610 = vrsqrt.f32 %v1801_v20  ;;  %vm1810_vm1 = vmor %vm1808_vm0, %vm1809_vm15  ;;  %vm1818_vm4 = vweird.f32 %v1801_v20 }
 0x3af   :  { %v1804_v59 = vmul.f32 %v2609_v40, %v1803_v51 }
 0x3b1   :  { %v1805_v61 = vmul.f32 0.5, %v1804_v59 }
 0x3b3   :  { %v1806_v16 = vsub.f32 1.5, %v1805_v61 }
 0x3b4   :  { %v2611_v28 = vpop.eup %2610 }
 0x3b5   :  { %v1807_v48 = vmul.f32 %v2609_v40, %v1806_v16  ;;  %v1813_v3 = vmul.f32 %v2611_v28, %v1801_v20  ;;  %vm1819_vm2 = vweird.f32 %v2611_v28 }
 0x3b6   :  { %vm1820_vm5 = vmor %vm1818_vm4, %vm1819_vm2 }
 0x3b7   :  { %v1811_v38 = vsel %vm1810_vm1, %v2609_v40, %v1807_v48  ;;  %v1814_v33 = vmul.f32 %v2611_v28, %v1813_v3 }
 0x3b8   :  { %v1822_v54 = vmul.f32 %v1811_v38, %v4048_v49  ;;  %v1823_v0 = vmul.f32 %v1811_v38, %v4050_v8  ;;  %v1824_v47 = vmul.f32 %v1811_v38, %v4052_v27  ;;  %v1825_v23 = vmul.f32 %v1811_v38, %v4054_v24 }
 0x3b9   :  { %v1826_v5 = vmul.f32 %v1811_v38, %v4060_v13  ;;  %v1827_v17 = vmul.f32 %v1811_v38, %v4064_v45  ;;  %v1828_v57 = vmul.f32 %v1811_v38, %v4068_v53  ;;  %v1829_v37 = vmul.f32 %v1811_v38, %v1755_v35 }
 0x3ba   :  { %v1838_v34 = vmax.f32 %v1822_v54, 0.0  ;;  %v1839_v12 = vmax.f32 %v1823_v0, 0.0  ;;  %v1840_v9 = vmax.f32 %v1824_v47, 0.0  ;;  %v1841_v4 = vmax.f32 %v1825_v23, 0.0 }
 0x3bb   :  { %v1842_v14 = vmax.f32 %v1826_v5, 0.0  ;;  %v1815_v49 = vmul.f32 0.5, %v1814_v33  ;;  %v1843_v8 = vmax.f32 %v1827_v17, 0.0  ;;  %v1844_v27 = vmax.f32 %v1828_v57, 0.0 }
 0x3bc   :  { %1854 = vst [vmem:[%s4174_s3] sm:$0xff] %v1838_v34  ;;  %v1845_v13 = vmax.f32 %v1829_v37, 0.0 }
 0x3bd   :  { %1855 = vst [vmem:[%s4174_s3 + $0x8] sm:$0xff] %v1839_v12  ;;  %v1816_v24 = vsub.f32 1.5, %v1815_v49 }
 0x3be   :  { %1856 = vst [vmem:[%s4174_s3 + $0x10] sm:$0xff] %v1840_v9 }
 0x3bf   :  { %1857 = vst [vmem:[%s4174_s3 + $0x18] sm:$0xff] %v1841_v4  ;;  %v1817_v45 = vmul.f32 %v2611_v28, %v1816_v24 }
 0x3c0   :  { %1858 = vst [vmem:[%s4174_s3 + $0x20] sm:$0xff] %v1842_v14 }
 0x3c1   :  { %1859 = vst [vmem:[%s4174_s3 + $0x28] sm:$0xff] %v1843_v8  ;;  %v1821_v53 = vsel %vm1820_vm5, %v2611_v28, %v1817_v45 }
 0x3c2   :  { %1860 = vst [vmem:[%s4174_s3 + $0x30] sm:$0xff] %v1844_v27  ;;  %v1830_v35 = vmul.f32 %v1821_v53, %v4072_v10  ;;  %v1831_v15 = vmul.f32 %v1821_v53, %v4074_v42  ;;  %v1832_v30 = vmul.f32 %v1821_v53, %v4076_v32  ;;  %v1833_v52 = vmul.f32 %v1821_v53, %v4080_v58 }
 0x3c3   :  { %1861 = vst [vmem:[%s4174_s3 + $0x38] sm:$0xff] %v1845_v13  ;;  %v1834_v7 = vmul.f32 %v1821_v53, %v4088_v6  ;;  %v1835_v44 = vmul.f32 %v1821_v53, %v4092_v29  ;;  %v1836_v11 = vmul.f32 %v1821_v53, %v4096_v19  ;;  %v1837_v31 = vmul.f32 %v1821_v53, %v4100_v43 }
 0x3c4   :  { %v1846_v50 = vmax.f32 %v1830_v35, 0.0  ;;  %v1847_v63 = vmax.f32 %v1831_v15, 0.0  ;;  %v1848_v18 = vmax.f32 %v1832_v30, 0.0  ;;  %v1849_v2 = vmax.f32 %v1833_v52, 0.0 }
 0x3c5   :  { %v1850_v39 = vmax.f32 %v1834_v7, 0.0  ;;  %v1851_v10 = vmax.f32 %v1835_v44, 0.0  ;;  %v1852_v42 = vmax.f32 %v1836_v11, 0.0  ;;  %v1853_v32 = vmax.f32 %v1837_v31, 0.0 }
 0x3c6   :  { %1862 = vst [vmem:[%s4174_s3 + $0x40] sm:$0xff] %v1846_v50 }
 0x3c7   :  { %1863 = vst [vmem:[%s4174_s3 + $0x48] sm:$0xff] %v1847_v63 }
 0x3c8   :  { %1864 = vst [vmem:[%s4174_s3 + $0x50] sm:$0xff] %v1848_v18 }
 0x3c9   :  { %1865 = vst [vmem:[%s4174_s3 + $0x58] sm:$0xff] %v1849_v2 }
 0x3ca   :  { %1866 = vst [vmem:[%s4174_s3 + $0x60] sm:$0xff] %v1850_v39 }
 0x3cb   :  { %1867 = vst [vmem:[%s4174_s3 + $0x68] sm:$0xff] %v1851_v10 }
 0x3cc   :  { %1868 = vst [vmem:[%s4174_s3 + $0x70] sm:$0xff] %v1852_v42 }
 0x3cd   :  { %1869 = vst [vmem:[%s4174_s3 + $0x78] sm:$0xff] %v1853_v32 }

</bundles_post_ra>
